<compile_context>
chip_gen: v7x
topology: tpu7x:2x2x1
jax: 0.10.0
libtpu: 0.0.40
codegen_flags: <defaults>
</compile_context>

<pallas_src>
import math
import functools

import jax
import jax.numpy as jnp
from jax import lax
from jax.experimental import pallas as pl
from jax.experimental.pallas import tpu as pltpu


CFG = dict(
    d_vocab=64,
    ctx_len=16,
    d_model=32,
    n_heads=4,
    d_mlp=64,
    n_layers=2,
    layer_norm_eps=1e-5,
    rotary=False,
    rmsnorm=False,
    swiglu=False,
)


# ----------------------------- kernel helpers -------------------------------

def _layernorm(x, w, b, eps):
    # matches PyTorch LayerNorm in the module: mean/var (unbiased=False) over last dim
    mu = jnp.mean(x, axis=-1, keepdims=True)
    var = jnp.mean((x - mu) * (x - mu), axis=-1, keepdims=True)
    return (x - mu) / jnp.sqrt(var + eps) * w + b


def _gelu_tanh(x):
    # TODO(synk): PyTorch F.gelu defaults to the exact erf GELU; tanh approximation
    # is used here because lax.erf has no guaranteed Mosaic lowering (diff ~1e-3).
    c = math.sqrt(2.0 / math.pi)
    return 0.5 * x * (1.0 + jnp.tanh(c * (x + 0.044715 * x * x * x)))


# ----------------------------- fused Pallas kernel ---------------------------

def fused_forward_kernel(eps, n_heads,
                         x_ref, ln1w_ref, ln1b_ref, wqkv_ref, wo_ref, bo_ref,
                         ln2w_ref, ln2b_ref, win_ref, wout_ref, wu_ref,
                         out_ref):
    """Whole forward for one batch element: all blocks + unembed, fully in VMEM."""
    resid = x_ref[...]                              # (S, D)
    S, D = resid.shape
    H = n_heads
    dh = D // H
    n_layers = wqkv_ref.shape[0]
    scale = 1.0 / math.sqrt(dh)                     # SDPA scaling = 1/sqrt(d_head)

    # additive causal mask (0 on/below diagonal, -1e30 above), built once
    row = lax.broadcasted_iota(jnp.int32, (S, S), 0)
    col = lax.broadcasted_iota(jnp.int32, (S, S), 1)
    mask_add = jnp.where(col <= row, 0.0, -1e30).astype(jnp.float32)

    for l in range(n_layers):                       # static, tiny layer loop
        # -------- attention --------
        h1 = _layernorm(resid, ln1w_ref[l], ln1b_ref[l], eps)               # (S, D)
        qkv = jnp.dot(h1, wqkv_ref[l], preferred_element_type=jnp.float32)  # (S, 3D)
        q_f = qkv[:, 0:D]
        k_f = qkv[:, D:2 * D]
        v_f = qkv[:, 2 * D:3 * D]
        # head-major views via cheap static lane slices (avoids 3-D transposes)
        q3 = jnp.stack([q_f[:, h * dh:(h + 1) * dh] for h in range(H)], axis=0)
        k3 = jnp.stack([k_f[:, h * dh:(h + 1) * dh] for h in range(H)], axis=0)
        v3 = jnp.stack([v_f[:, h * dh:(h + 1) * dh] for h in range(H)], axis=0)

        scores = jnp.einsum('hqd,hkd->hqk', q3, k3,
                            preferred_element_type=jnp.float32) * scale     # (H,S,S)
        scores = scores + mask_add
        m = jnp.max(scores, axis=-1, keepdims=True)
        p = jnp.exp(scores - m)
        p = p * pl.reciprocal(jnp.sum(p, axis=-1, keepdims=True), approx=True)
        o3 = jnp.einsum('hqk,hkd->hqd', p, v3,
                        preferred_element_type=jnp.float32)                 # (H,S,dh)
        o_f = jnp.concatenate([o3[h] for h in range(H)], axis=-1)           # (S, D)

        attn = jnp.dot(o_f, wo_ref[l], preferred_element_type=jnp.float32) + bo_ref[l]
        resid = resid + attn

        # -------- MLP --------
        h2 = _layernorm(resid, ln2w_ref[l], ln2b_ref[l], eps)
        pre = jnp.dot(h2, win_ref[l], preferred_element_type=jnp.float32)   # (S, d_mlp)
        mlp = jnp.dot(_gelu_tanh(pre), wout_ref[l],
                      preferred_element_type=jnp.float32)                   # (S, D)
        resid = resid + mlp

    # -------- unembed (single full-ref store) --------
    out_ref[...] = jnp.dot(resid, wu_ref[...], preferred_element_type=jnp.float32)


# ----------------------------- wrapper ---------------------------------------

def _full_block_spec(shape):
    n = len(shape)
    return pl.BlockSpec(shape, lambda b, _n=n: (0,) * _n)


def transformer_forward(tokens, params, cfg):
    B, S = tokens.shape
    D = cfg["d_model"]
    V = cfg["d_vocab"]

    # glue: embedding gather + learned positional embedding (pure indexing, plain JAX)
    resid0 = params["W_E"][tokens] + params["W_P"][:S][None, :, :]

    weights = (params["ln1_w"], params["ln1_b"], params["W_QKV"], params["W_O"],
               params["b_O"], params["ln2_w"], params["ln2_b"],
               params["W_in"], params["W_out"], params["W_U"])

    kern = functools.partial(fused_forward_kernel,
                             cfg["layer_norm_eps"], cfg["n_heads"])
    return pl.pallas_call(
        kern,
        grid=(B,),
        out_shape=jax.ShapeDtypeStruct((B, S, V), jnp.float32),
        in_specs=[pl.BlockSpec((None, S, D), lambda b: (b, 0, 0))]
                 + [_full_block_spec(w.shape) for w in weights],
        out_specs=pl.BlockSpec((None, S, V), lambda b: (b, 0, 0)),
        compiler_params=pltpu.CompilerParams(
            dimension_semantics=("parallel",)),
    )(resid0, *weights)


# ----------------------------- parameters ------------------------------------

def _uniform(key, shape, bound):
    return jax.random.uniform(key, shape, jnp.float32, -bound, bound)


def init_params(key, cfg):
    d_vocab = cfg["d_vocab"]
    d_model = cfg["d_model"]
    n_heads = cfg["n_heads"]
    d_mlp = cfg["d_mlp"]
    ctx_len = cfg["ctx_len"]
    n_layers = cfg["n_layers"]
    d_head = d_model // n_heads

    keys = jax.random.split(key, 3 + n_layers)
    params = {
        "W_E": _uniform(keys[0], (d_vocab, d_model), math.sqrt(1.0 / d_vocab)),
        "W_P": _uniform(keys[1], (ctx_len, d_model), math.sqrt(1.0 / d_model)),
        "W_U": _uniform(keys[2], (d_model, d_vocab), math.sqrt(1.0 / d_model)),
    }

    a_attn = math.sqrt(1.0 / d_model)
    per_layer = {k: [] for k in ("ln1_w", "ln1_b", "ln2_w", "ln2_b",
                                 "W_QKV", "W_O", "b_O", "W_in", "W_out")}

    def fuse_heads(w):  # (H, D, dh) PyTorch layout -> (D, H*dh) math layout
        return jnp.transpose(w, (1, 0, 2)).reshape(d_model, n_heads * d_head)

    for l in range(n_layers):
        lk = jax.random.split(keys[3 + l], 6)
        W_Q = _uniform(lk[0], (n_heads, d_model, d_head), a_attn)
        W_K = _uniform(lk[1], (n_heads, d_model, d_head), a_attn)
        W_V = _uniform(lk[2], (n_heads, d_model, d_head), a_attn)
        W_O = _uniform(lk[3], (n_heads, d_head, d_model), a_attn)

        per_layer["W_QKV"].append(
            jnp.concatenate([fuse_heads(W_Q), fuse_heads(W_K), fuse_heads(W_V)],
                            axis=1))                                   # (D, 3D)
        per_layer["W_O"].append(W_O.reshape(n_heads * d_head, d_model))  # (D, D)
        per_layer["b_O"].append(jnp.zeros((1, d_model), jnp.float32))
        per_layer["ln1_w"].append(jnp.ones((1, d_model), jnp.float32))
        per_layer["ln1_b"].append(jnp.zeros((1, d_model), jnp.float32))
        per_layer["ln2_w"].append(jnp.ones((1, d_model), jnp.float32))
        per_layer["ln2_b"].append(jnp.zeros((1, d_model), jnp.float32))
        # nn.Linear default init bound = 1/sqrt(fan_in); stored (in, out)
        per_layer["W_in"].append(
            _uniform(lk[4], (d_model, d_mlp), 1.0 / math.sqrt(d_model)))
        per_layer["W_out"].append(
            _uniform(lk[5], (d_mlp, d_model), 1.0 / math.sqrt(d_mlp)))

    for k, v in per_layer.items():
        params[k] = jnp.stack(v, axis=0)
    return params


# ----------------------------- main -------------------------------------------

if __name__ == "__main__":
    key = jax.random.PRNGKey(0)
    pkey, tkey = jax.random.split(key)
    params = init_params(pkey, CFG)

    batch, seq = 2, 8
    tokens = jax.random.randint(tkey, (batch, seq), 0, CFG["d_vocab"], jnp.int32)

    logits = transformer_forward(tokens, params, CFG)
    jax.block_until_ready(logits)
    assert logits.shape == (batch, seq, CFG["d_vocab"]), logits.shape
    assert bool(jnp.all(jnp.isfinite(logits)))
    print("KERNEL_OK")
</pallas_src>

<mosaic_0001>
module attributes {stable_mosaic.version = 11 : i64} {
  func.func @fused_forward_kernel(%arg0: i32, %arg1: memref<1x8x32xf32, #tpu.memory_space<vmem>>, %arg2: memref<2x1x32xf32, #tpu.memory_space<vmem>>, %arg3: memref<2x1x32xf32, #tpu.memory_space<vmem>>, %arg4: memref<2x32x96xf32, #tpu.memory_space<vmem>>, %arg5: memref<2x32x32xf32, #tpu.memory_space<vmem>>, %arg6: memref<2x1x32xf32, #tpu.memory_space<vmem>>, %arg7: memref<2x1x32xf32, #tpu.memory_space<vmem>>, %arg8: memref<2x1x32xf32, #tpu.memory_space<vmem>>, %arg9: memref<2x32x64xf32, #tpu.memory_space<vmem>>, %arg10: memref<2x64x32xf32, #tpu.memory_space<vmem>>, %arg11: memref<32x64xf32, #tpu.memory_space<vmem>>, %arg12: memref<1x8x64xf32, #tpu.memory_space<vmem>>) attributes {dimension_semantics = [#tpu.dimension_semantics<parallel>], iteration_bounds = array<i64: 2>, scalar_prefetch = 0 : i64, scratch_operands = 0 : i64, tpu.core_type = #tpu.core_type<tc>, window_params = [{transform_indices = @transform_0, window_bounds = array<i64: 1, 8, 32>}, {pipeline_mode = #tpu.pipeline_mode<synchronous>, transform_indices = @transform_1, window_bounds = array<i64: 2, 1, 32>}, {pipeline_mode = #tpu.pipeline_mode<synchronous>, transform_indices = @transform_2, window_bounds = array<i64: 2, 1, 32>}, {pipeline_mode = #tpu.pipeline_mode<synchronous>, transform_indices = @transform_3, window_bounds = array<i64: 2, 32, 96>}, {pipeline_mode = #tpu.pipeline_mode<synchronous>, transform_indices = @transform_4, window_bounds = array<i64: 2, 32, 32>}, {pipeline_mode = #tpu.pipeline_mode<synchronous>, transform_indices = @transform_5, window_bounds = array<i64: 2, 1, 32>}, {pipeline_mode = #tpu.pipeline_mode<synchronous>, transform_indices = @transform_6, window_bounds = array<i64: 2, 1, 32>}, {pipeline_mode = #tpu.pipeline_mode<synchronous>, transform_indices = @transform_7, window_bounds = array<i64: 2, 1, 32>}, {pipeline_mode = #tpu.pipeline_mode<synchronous>, transform_indices = @transform_8, window_bounds = array<i64: 2, 32, 64>}, {pipeline_mode = #tpu.pipeline_mode<synchronous>, transform_indices = @transform_9, window_bounds = array<i64: 2, 64, 32>}, {pipeline_mode = #tpu.pipeline_mode<synchronous>, transform_indices = @transform_10, window_bounds = array<i64: 32, 64>}, {transform_indices = @transform_11, window_bounds = array<i64: 1, 8, 64>}]} {
    %c0 = arith.constant 0 : index
    %c0_0 = arith.constant 0 : index
    %c0_1 = arith.constant 0 : index
    %0 = vector.load %arg1[%c0, %c0_0, %c0_1] : memref<1x8x32xf32, #tpu.memory_space<vmem>>, vector<1x8x32xf32>
    %1 = vector.shape_cast %0 : vector<1x8x32xf32> to vector<8x32xf32>
    %2 = tpu.iota {dimensions = array<i32: 0>} : vector<8x8xi32>
    %3 = tpu.iota {dimensions = array<i32: 1>} : vector<8x8xi32>
    %4 = arith.cmpi sle, %3, %2 : vector<8x8xi32>
    %cst = arith.constant 0.000000e+00 : f32
    %cst_2 = arith.constant -1.000000e+30 : f32
    %5 = vector.broadcast %cst : f32 to vector<8x8xf32>
    %6 = vector.broadcast %cst_2 : f32 to vector<8x8xf32>
    %7 = arith.select %4, %5, %6 : vector<8x8xi1>, vector<8x8xf32>
    %c0_3 = arith.constant 0 : index
    %c0_4 = arith.constant 0 : index
    %c0_5 = arith.constant 0 : index
    %8 = vector.load %arg2[%c0_3, %c0_4, %c0_5] : memref<2x1x32xf32, #tpu.memory_space<vmem>>, vector<1x1x32xf32>
    %9 = vector.shape_cast %8 : vector<1x1x32xf32> to vector<1x32xf32>
    %c0_6 = arith.constant 0 : index
    %c0_7 = arith.constant 0 : index
    %c0_8 = arith.constant 0 : index
    %10 = vector.load %arg3[%c0_6, %c0_7, %c0_8] : memref<2x1x32xf32, #tpu.memory_space<vmem>>, vector<1x1x32xf32>
    %11 = vector.shape_cast %10 : vector<1x1x32xf32> to vector<1x32xf32>
    %cst_9 = arith.constant dense<0.000000e+00> : vector<8xf32>
    %12 = vector.multi_reduction <add>, %1, %cst_9 [1] : vector<8x32xf32> to vector<8xf32>
    %13 = vector.shape_cast %12 : vector<8xf32> to vector<8x1xf32>
    %cst_10 = arith.constant 3.200000e+01 : f32
    %14 = vector.broadcast %cst_10 : f32 to vector<8x1xf32>
    %15 = arith.divf %13, %14 : vector<8x1xf32>
    %16 = vector.broadcast %15 : vector<8x1xf32> to vector<8x32xf32>
    %17 = arith.subf %1, %16 : vector<8x32xf32>
    %18 = vector.broadcast %15 : vector<8x1xf32> to vector<8x32xf32>
    %19 = arith.subf %1, %18 : vector<8x32xf32>
    %20 = arith.mulf %17, %19 : vector<8x32xf32>
    %cst_11 = arith.constant dense<0.000000e+00> : vector<8xf32>
    %21 = vector.multi_reduction <add>, %20, %cst_11 [1] : vector<8x32xf32> to vector<8xf32>
    %22 = vector.shape_cast %21 : vector<8xf32> to vector<8x1xf32>
    %cst_12 = arith.constant 3.200000e+01 : f32
    %23 = vector.broadcast %cst_12 : f32 to vector<8x1xf32>
    %24 = arith.divf %22, %23 : vector<8x1xf32>
    %25 = vector.broadcast %15 : vector<8x1xf32> to vector<8x32xf32>
    %26 = arith.subf %1, %25 : vector<8x32xf32>
    %cst_13 = arith.constant 9.99999974E-6 : f32
    %27 = vector.broadcast %cst_13 : f32 to vector<8x1xf32>
    %28 = arith.addf %24, %27 : vector<8x1xf32>
    %29 = math.sqrt %28 : vector<8x1xf32>
    %30 = vector.broadcast %29 : vector<8x1xf32> to vector<8x32xf32>
    %31 = arith.divf %26, %30 : vector<8x32xf32>
    %32 = vector.broadcast %9 : vector<1x32xf32> to vector<8x32xf32>
    %33 = arith.mulf %31, %32 : vector<8x32xf32>
    %34 = vector.broadcast %11 : vector<1x32xf32> to vector<8x32xf32>
    %35 = arith.addf %33, %34 : vector<8x32xf32>
    %c0_14 = arith.constant 0 : index
    %c0_15 = arith.constant 0 : index
    %c0_16 = arith.constant 0 : index
    %36 = vector.load %arg4[%c0_14, %c0_15, %c0_16] : memref<2x32x96xf32, #tpu.memory_space<vmem>>, vector<1x32x96xf32>
    %37 = vector.shape_cast %36 : vector<1x32x96xf32> to vector<32x96xf32>
    %cst_17 = arith.constant dense<0.000000e+00> : vector<8x96xf32>
    %38 = tpu.matmul %35, %37, %cst_17 {dimension_numbers = #tpu.dot_dimension_numbers<[1], [0], [0], [1], [0, 0, 1, 1], [], []>} : vector<8x32xf32>, vector<32x96xf32>, vector<8x96xf32> -> vector<8x96xf32>
    %39 = vector.extract_strided_slice %38 {offsets = [0, 0], sizes = [8, 32], strides = [1, 1]} : vector<8x96xf32> to vector<8x32xf32>
    %40 = vector.extract_strided_slice %38 {offsets = [0, 32], sizes = [8, 32], strides = [1, 1]} : vector<8x96xf32> to vector<8x32xf32>
    %41 = vector.extract_strided_slice %38 {offsets = [0, 64], sizes = [8, 32], strides = [1, 1]} : vector<8x96xf32> to vector<8x32xf32>
    %42 = vector.extract_strided_slice %39 {offsets = [0, 0], sizes = [8, 8], strides = [1, 1]} : vector<8x32xf32> to vector<8x8xf32>
    %43 = vector.extract_strided_slice %39 {offsets = [0, 8], sizes = [8, 8], strides = [1, 1]} : vector<8x32xf32> to vector<8x8xf32>
    %44 = vector.extract_strided_slice %39 {offsets = [0, 16], sizes = [8, 8], strides = [1, 1]} : vector<8x32xf32> to vector<8x8xf32>
    %45 = vector.extract_strided_slice %39 {offsets = [0, 24], sizes = [8, 8], strides = [1, 1]} : vector<8x32xf32> to vector<8x8xf32>
    %46 = vector.shape_cast %42 : vector<8x8xf32> to vector<1x8x8xf32>
    %47 = vector.shape_cast %43 : vector<8x8xf32> to vector<1x8x8xf32>
    %48 = vector.shape_cast %44 : vector<8x8xf32> to vector<1x8x8xf32>
    %49 = vector.shape_cast %45 : vector<8x8xf32> to vector<1x8x8xf32>
    %50 = tpu.concatenate %46, %47, %48, %49 in 0 : vector<1x8x8xf32>, vector<1x8x8xf32>, vector<1x8x8xf32>, vector<1x8x8xf32> -> vector<4x8x8xf32>
    %51 = vector.extract_strided_slice %40 {offsets = [0, 0], sizes = [8, 8], strides = [1, 1]} : vector<8x32xf32> to vector<8x8xf32>
    %52 = vector.extract_strided_slice %40 {offsets = [0, 8], sizes = [8, 8], strides = [1, 1]} : vector<8x32xf32> to vector<8x8xf32>
    %53 = vector.extract_strided_slice %40 {offsets = [0, 16], sizes = [8, 8], strides = [1, 1]} : vector<8x32xf32> to vector<8x8xf32>
    %54 = vector.extract_strided_slice %40 {offsets = [0, 24], sizes = [8, 8], strides = [1, 1]} : vector<8x32xf32> to vector<8x8xf32>
    %55 = vector.shape_cast %51 : vector<8x8xf32> to vector<1x8x8xf32>
    %56 = vector.shape_cast %52 : vector<8x8xf32> to vector<1x8x8xf32>
    %57 = vector.shape_cast %53 : vector<8x8xf32> to vector<1x8x8xf32>
    %58 = vector.shape_cast %54 : vector<8x8xf32> to vector<1x8x8xf32>
    %59 = tpu.concatenate %55, %56, %57, %58 in 0 : vector<1x8x8xf32>, vector<1x8x8xf32>, vector<1x8x8xf32>, vector<1x8x8xf32> -> vector<4x8x8xf32>
    %60 = vector.extract_strided_slice %41 {offsets = [0, 0], sizes = [8, 8], strides = [1, 1]} : vector<8x32xf32> to vector<8x8xf32>
    %61 = vector.extract_strided_slice %41 {offsets = [0, 8], sizes = [8, 8], strides = [1, 1]} : vector<8x32xf32> to vector<8x8xf32>
    %62 = vector.extract_strided_slice %41 {offsets = [0, 16], sizes = [8, 8], strides = [1, 1]} : vector<8x32xf32> to vector<8x8xf32>
    %63 = vector.extract_strided_slice %41 {offsets = [0, 24], sizes = [8, 8], strides = [1, 1]} : vector<8x32xf32> to vector<8x8xf32>
    %64 = vector.shape_cast %60 : vector<8x8xf32> to vector<1x8x8xf32>
    %65 = vector.shape_cast %61 : vector<8x8xf32> to vector<1x8x8xf32>
    %66 = vector.shape_cast %62 : vector<8x8xf32> to vector<1x8x8xf32>
    %67 = vector.shape_cast %63 : vector<8x8xf32> to vector<1x8x8xf32>
    %68 = tpu.concatenate %64, %65, %66, %67 in 0 : vector<1x8x8xf32>, vector<1x8x8xf32>, vector<1x8x8xf32>, vector<1x8x8xf32> -> vector<4x8x8xf32>
    "tpu.trace_start"() <{level = 10 : i32, message = "hqd,hkd->hqk"}> : () -> ()
    %cst_18 = arith.constant dense<0.000000e+00> : vector<4x8x8xf32>
    %69 = tpu.matmul %50, %59, %cst_18 {dimension_numbers = #tpu.dot_dimension_numbers<[2], [2], [1], [1], [0, 0, 0, 1, 1, 1], [0], [0]>} : vector<4x8x8xf32>, vector<4x8x8xf32>, vector<4x8x8xf32> -> vector<4x8x8xf32>
    "tpu.trace_stop"() : () -> ()
    %cst_19 = arith.constant 0.353553385 : f32
    %70 = vector.broadcast %cst_19 : f32 to vector<4x8x8xf32>
    %71 = arith.mulf %69, %70 : vector<4x8x8xf32>
    %72 = vector.shape_cast %7 : vector<8x8xf32> to vector<1x8x8xf32>
    %73 = vector.broadcast %72 : vector<1x8x8xf32> to vector<4x8x8xf32>
    %74 = arith.addf %71, %73 : vector<4x8x8xf32>
    %cst_20 = arith.constant dense<0xFF800000> : vector<4x8xf32>
    %75 = vector.multi_reduction <maximumf>, %74, %cst_20 [2] : vector<4x8x8xf32> to vector<4x8xf32>
    %76 = vector.shape_cast %75 : vector<4x8xf32> to vector<4x8x1xf32>
    %77 = vector.broadcast %76 : vector<4x8x1xf32> to vector<4x8x8xf32>
    %78 = arith.subf %74, %77 : vector<4x8x8xf32>
    %79 = math.exp %78 : vector<4x8x8xf32>
    %cst_21 = arith.constant dense<0.000000e+00> : vector<4x8xf32>
    %80 = vector.multi_reduction <add>, %79, %cst_21 [2] : vector<4x8x8xf32> to vector<4x8xf32>
    %81 = vector.shape_cast %80 : vector<4x8xf32> to vector<4x8x1xf32>
    %82 = tpu.reciprocal %81 {approx = true} : vector<4x8x1xf32> -> vector<4x8x1xf32>
    %83 = vector.broadcast %82 : vector<4x8x1xf32> to vector<4x8x8xf32>
    %84 = arith.mulf %79, %83 : vector<4x8x8xf32>
    "tpu.trace_start"() <{level = 10 : i32, message = "hqk,hkd->hqd"}> : () -> ()
    %cst_22 = arith.constant dense<0.000000e+00> : vector<4x8x8xf32>
    %85 = tpu.matmul %84, %68, %cst_22 {dimension_numbers = #tpu.dot_dimension_numbers<[2], [1], [1], [2], [0, 0, 0, 1, 1, 2], [0], [0]>} : vector<4x8x8xf32>, vector<4x8x8xf32>, vector<4x8x8xf32> -> vector<4x8x8xf32>
    "tpu.trace_stop"() : () -> ()
    %86 = vector.extract_strided_slice %85 {offsets = [0, 0, 0], sizes = [1, 8, 8], strides = [1, 1, 1]} : vector<4x8x8xf32> to vector<1x8x8xf32>
    %87 = vector.shape_cast %86 : vector<1x8x8xf32> to vector<8x8xf32>
    %88 = vector.extract_strided_slice %85 {offsets = [1, 0, 0], sizes = [1, 8, 8], strides = [1, 1, 1]} : vector<4x8x8xf32> to vector<1x8x8xf32>
    %89 = vector.shape_cast %88 : vector<1x8x8xf32> to vector<8x8xf32>
    %90 = vector.extract_strided_slice %85 {offsets = [2, 0, 0], sizes = [1, 8, 8], strides = [1, 1, 1]} : vector<4x8x8xf32> to vector<1x8x8xf32>
    %91 = vector.shape_cast %90 : vector<1x8x8xf32> to vector<8x8xf32>
    %92 = vector.extract_strided_slice %85 {offsets = [3, 0, 0], sizes = [1, 8, 8], strides = [1, 1, 1]} : vector<4x8x8xf32> to vector<1x8x8xf32>
    %93 = vector.shape_cast %92 : vector<1x8x8xf32> to vector<8x8xf32>
    %94 = tpu.concatenate %87, %89, %91, %93 in 1 : vector<8x8xf32>, vector<8x8xf32>, vector<8x8xf32>, vector<8x8xf32> -> vector<8x32xf32>
    %c0_23 = arith.constant 0 : index
    %c0_24 = arith.constant 0 : index
    %c0_25 = arith.constant 0 : index
    %95 = vector.load %arg5[%c0_23, %c0_24, %c0_25] : memref<2x32x32xf32, #tpu.memory_space<vmem>>, vector<1x32x32xf32>
    %96 = vector.shape_cast %95 : vector<1x32x32xf32> to vector<32x32xf32>
    %cst_26 = arith.constant dense<0.000000e+00> : vector<8x32xf32>
    %97 = tpu.matmul %94, %96, %cst_26 {dimension_numbers = #tpu.dot_dimension_numbers<[1], [0], [0], [1], [0, 0, 1, 1], [], []>} : vector<8x32xf32>, vector<32x32xf32>, vector<8x32xf32> -> vector<8x32xf32>
    %c0_27 = arith.constant 0 : index
    %c0_28 = arith.constant 0 : index
    %c0_29 = arith.constant 0 : index
    %98 = vector.load %arg6[%c0_27, %c0_28, %c0_29] : memref<2x1x32xf32, #tpu.memory_space<vmem>>, vector<1x1x32xf32>
    %99 = vector.shape_cast %98 : vector<1x1x32xf32> to vector<1x32xf32>
    %100 = vector.broadcast %99 : vector<1x32xf32> to vector<8x32xf32>
    %101 = arith.addf %97, %100 : vector<8x32xf32>
    %102 = arith.addf %1, %101 : vector<8x32xf32>
    %c0_30 = arith.constant 0 : index
    %c0_31 = arith.constant 0 : index
    %c0_32 = arith.constant 0 : index
    %103 = vector.load %arg7[%c0_30, %c0_31, %c0_32] : memref<2x1x32xf32, #tpu.memory_space<vmem>>, vector<1x1x32xf32>
    %104 = vector.shape_cast %103 : vector<1x1x32xf32> to vector<1x32xf32>
    %c0_33 = arith.constant 0 : index
    %c0_34 = arith.constant 0 : index
    %c0_35 = arith.constant 0 : index
    %105 = vector.load %arg8[%c0_33, %c0_34, %c0_35] : memref<2x1x32xf32, #tpu.memory_space<vmem>>, vector<1x1x32xf32>
    %106 = vector.shape_cast %105 : vector<1x1x32xf32> to vector<1x32xf32>
    %cst_36 = arith.constant dense<0.000000e+00> : vector<8xf32>
    %107 = vector.multi_reduction <add>, %102, %cst_36 [1] : vector<8x32xf32> to vector<8xf32>
    %108 = vector.shape_cast %107 : vector<8xf32> to vector<8x1xf32>
    %cst_37 = arith.constant 3.200000e+01 : f32
    %109 = vector.broadcast %cst_37 : f32 to vector<8x1xf32>
    %110 = arith.divf %108, %109 : vector<8x1xf32>
    %111 = vector.broadcast %110 : vector<8x1xf32> to vector<8x32xf32>
    %112 = arith.subf %102, %111 : vector<8x32xf32>
    %113 = vector.broadcast %110 : vector<8x1xf32> to vector<8x32xf32>
    %114 = arith.subf %102, %113 : vector<8x32xf32>
    %115 = arith.mulf %112, %114 : vector<8x32xf32>
    %cst_38 = arith.constant dense<0.000000e+00> : vector<8xf32>
    %116 = vector.multi_reduction <add>, %115, %cst_38 [1] : vector<8x32xf32> to vector<8xf32>
    %117 = vector.shape_cast %116 : vector<8xf32> to vector<8x1xf32>
    %cst_39 = arith.constant 3.200000e+01 : f32
    %118 = vector.broadcast %cst_39 : f32 to vector<8x1xf32>
    %119 = arith.divf %117, %118 : vector<8x1xf32>
    %120 = vector.broadcast %110 : vector<8x1xf32> to vector<8x32xf32>
    %121 = arith.subf %102, %120 : vector<8x32xf32>
    %cst_40 = arith.constant 9.99999974E-6 : f32
    %122 = vector.broadcast %cst_40 : f32 to vector<8x1xf32>
    %123 = arith.addf %119, %122 : vector<8x1xf32>
    %124 = math.sqrt %123 : vector<8x1xf32>
    %125 = vector.broadcast %124 : vector<8x1xf32> to vector<8x32xf32>
    %126 = arith.divf %121, %125 : vector<8x32xf32>
    %127 = vector.broadcast %104 : vector<1x32xf32> to vector<8x32xf32>
    %128 = arith.mulf %126, %127 : vector<8x32xf32>
    %129 = vector.broadcast %106 : vector<1x32xf32> to vector<8x32xf32>
    %130 = arith.addf %128, %129 : vector<8x32xf32>
    %c0_41 = arith.constant 0 : index
    %c0_42 = arith.constant 0 : index
    %c0_43 = arith.constant 0 : index
    %131 = vector.load %arg9[%c0_41, %c0_42, %c0_43] : memref<2x32x64xf32, #tpu.memory_space<vmem>>, vector<1x32x64xf32>
    %132 = vector.shape_cast %131 : vector<1x32x64xf32> to vector<32x64xf32>
    %cst_44 = arith.constant dense<0.000000e+00> : vector<8x64xf32>
    %133 = tpu.matmul %130, %132, %cst_44 {dimension_numbers = #tpu.dot_dimension_numbers<[1], [0], [0], [1], [0, 0, 1, 1], [], []>} : vector<8x32xf32>, vector<32x64xf32>, vector<8x64xf32> -> vector<8x64xf32>
    %cst_45 = arith.constant 5.000000e-01 : f32
    %134 = vector.broadcast %cst_45 : f32 to vector<8x64xf32>
    %135 = arith.mulf %134, %133 : vector<8x64xf32>
    %cst_46 = arith.constant 4.471500e-02 : f32
    %136 = vector.broadcast %cst_46 : f32 to vector<8x64xf32>
    %137 = arith.mulf %136, %133 : vector<8x64xf32>
    %138 = arith.mulf %137, %133 : vector<8x64xf32>
    %139 = arith.mulf %138, %133 : vector<8x64xf32>
    %140 = arith.addf %133, %139 : vector<8x64xf32>
    %cst_47 = arith.constant 0.797884583 : f32
    %141 = vector.broadcast %cst_47 : f32 to vector<8x64xf32>
    %142 = arith.mulf %141, %140 : vector<8x64xf32>
    %143 = math.tanh %142 : vector<8x64xf32>
    %cst_48 = arith.constant 1.000000e+00 : f32
    %144 = vector.broadcast %cst_48 : f32 to vector<8x64xf32>
    %145 = arith.addf %144, %143 : vector<8x64xf32>
    %146 = arith.mulf %135, %145 : vector<8x64xf32>
    %c0_49 = arith.constant 0 : index
    %c0_50 = arith.constant 0 : index
    %c0_51 = arith.constant 0 : index
    %147 = vector.load %arg10[%c0_49, %c0_50, %c0_51] : memref<2x64x32xf32, #tpu.memory_space<vmem>>, vector<1x64x32xf32>
    %148 = vector.shape_cast %147 : vector<1x64x32xf32> to vector<64x32xf32>
    %cst_52 = arith.constant dense<0.000000e+00> : vector<8x32xf32>
    %149 = tpu.matmul %146, %148, %cst_52 {dimension_numbers = #tpu.dot_dimension_numbers<[1], [0], [0], [1], [0, 0, 1, 1], [], []>} : vector<8x64xf32>, vector<64x32xf32>, vector<8x32xf32> -> vector<8x32xf32>
    %150 = arith.addf %102, %149 : vector<8x32xf32>
    %c1 = arith.constant 1 : index
    %c0_53 = arith.constant 0 : index
    %c0_54 = arith.constant 0 : index
    %151 = vector.load %arg2[%c1, %c0_53, %c0_54] : memref<2x1x32xf32, #tpu.memory_space<vmem>>, vector<1x1x32xf32>
    %152 = vector.shape_cast %151 : vector<1x1x32xf32> to vector<1x32xf32>
    %c1_55 = arith.constant 1 : index
    %c0_56 = arith.constant 0 : index
    %c0_57 = arith.constant 0 : index
    %153 = vector.load %arg3[%c1_55, %c0_56, %c0_57] : memref<2x1x32xf32, #tpu.memory_space<vmem>>, vector<1x1x32xf32>
    %154 = vector.shape_cast %153 : vector<1x1x32xf32> to vector<1x32xf32>
    %cst_58 = arith.constant dense<0.000000e+00> : vector<8xf32>
    %155 = vector.multi_reduction <add>, %150, %cst_58 [1] : vector<8x32xf32> to vector<8xf32>
    %156 = vector.shape_cast %155 : vector<8xf32> to vector<8x1xf32>
    %cst_59 = arith.constant 3.200000e+01 : f32
    %157 = vector.broadcast %cst_59 : f32 to vector<8x1xf32>
    %158 = arith.divf %156, %157 : vector<8x1xf32>
    %159 = vector.broadcast %158 : vector<8x1xf32> to vector<8x32xf32>
    %160 = arith.subf %150, %159 : vector<8x32xf32>
    %161 = vector.broadcast %158 : vector<8x1xf32> to vector<8x32xf32>
    %162 = arith.subf %150, %161 : vector<8x32xf32>
    %163 = arith.mulf %160, %162 : vector<8x32xf32>
    %cst_60 = arith.constant dense<0.000000e+00> : vector<8xf32>
    %164 = vector.multi_reduction <add>, %163, %cst_60 [1] : vector<8x32xf32> to vector<8xf32>
    %165 = vector.shape_cast %164 : vector<8xf32> to vector<8x1xf32>
    %cst_61 = arith.constant 3.200000e+01 : f32
    %166 = vector.broadcast %cst_61 : f32 to vector<8x1xf32>
    %167 = arith.divf %165, %166 : vector<8x1xf32>
    %168 = vector.broadcast %158 : vector<8x1xf32> to vector<8x32xf32>
    %169 = arith.subf %150, %168 : vector<8x32xf32>
    %cst_62 = arith.constant 9.99999974E-6 : f32
    %170 = vector.broadcast %cst_62 : f32 to vector<8x1xf32>
    %171 = arith.addf %167, %170 : vector<8x1xf32>
    %172 = math.sqrt %171 : vector<8x1xf32>
    %173 = vector.broadcast %172 : vector<8x1xf32> to vector<8x32xf32>
    %174 = arith.divf %169, %173 : vector<8x32xf32>
    %175 = vector.broadcast %152 : vector<1x32xf32> to vector<8x32xf32>
    %176 = arith.mulf %174, %175 : vector<8x32xf32>
    %177 = vector.broadcast %154 : vector<1x32xf32> to vector<8x32xf32>
    %178 = arith.addf %176, %177 : vector<8x32xf32>
    %c1_63 = arith.constant 1 : index
    %c0_64 = arith.constant 0 : index
    %c0_65 = arith.constant 0 : index
    %179 = vector.load %arg4[%c1_63, %c0_64, %c0_65] : memref<2x32x96xf32, #tpu.memory_space<vmem>>, vector<1x32x96xf32>
    %180 = vector.shape_cast %179 : vector<1x32x96xf32> to vector<32x96xf32>
    %cst_66 = arith.constant dense<0.000000e+00> : vector<8x96xf32>
    %181 = tpu.matmul %178, %180, %cst_66 {dimension_numbers = #tpu.dot_dimension_numbers<[1], [0], [0], [1], [0, 0, 1, 1], [], []>} : vector<8x32xf32>, vector<32x96xf32>, vector<8x96xf32> -> vector<8x96xf32>
    %182 = vector.extract_strided_slice %181 {offsets = [0, 0], sizes = [8, 32], strides = [1, 1]} : vector<8x96xf32> to vector<8x32xf32>
    %183 = vector.extract_strided_slice %181 {offsets = [0, 32], sizes = [8, 32], strides = [1, 1]} : vector<8x96xf32> to vector<8x32xf32>
    %184 = vector.extract_strided_slice %181 {offsets = [0, 64], sizes = [8, 32], strides = [1, 1]} : vector<8x96xf32> to vector<8x32xf32>
    %185 = vector.extract_strided_slice %182 {offsets = [0, 0], sizes = [8, 8], strides = [1, 1]} : vector<8x32xf32> to vector<8x8xf32>
    %186 = vector.extract_strided_slice %182 {offsets = [0, 8], sizes = [8, 8], strides = [1, 1]} : vector<8x32xf32> to vector<8x8xf32>
    %187 = vector.extract_strided_slice %182 {offsets = [0, 16], sizes = [8, 8], strides = [1, 1]} : vector<8x32xf32> to vector<8x8xf32>
    %188 = vector.extract_strided_slice %182 {offsets = [0, 24], sizes = [8, 8], strides = [1, 1]} : vector<8x32xf32> to vector<8x8xf32>
    %189 = vector.shape_cast %185 : vector<8x8xf32> to vector<1x8x8xf32>
    %190 = vector.shape_cast %186 : vector<8x8xf32> to vector<1x8x8xf32>
    %191 = vector.shape_cast %187 : vector<8x8xf32> to vector<1x8x8xf32>
    %192 = vector.shape_cast %188 : vector<8x8xf32> to vector<1x8x8xf32>
    %193 = tpu.concatenate %189, %190, %191, %192 in 0 : vector<1x8x8xf32>, vector<1x8x8xf32>, vector<1x8x8xf32>, vector<1x8x8xf32> -> vector<4x8x8xf32>
    %194 = vector.extract_strided_slice %183 {offsets = [0, 0], sizes = [8, 8], strides = [1, 1]} : vector<8x32xf32> to vector<8x8xf32>
    %195 = vector.extract_strided_slice %183 {offsets = [0, 8], sizes = [8, 8], strides = [1, 1]} : vector<8x32xf32> to vector<8x8xf32>
    %196 = vector.extract_strided_slice %183 {offsets = [0, 16], sizes = [8, 8], strides = [1, 1]} : vector<8x32xf32> to vector<8x8xf32>
    %197 = vector.extract_strided_slice %183 {offsets = [0, 24], sizes = [8, 8], strides = [1, 1]} : vector<8x32xf32> to vector<8x8xf32>
    %198 = vector.shape_cast %194 : vector<8x8xf32> to vector<1x8x8xf32>
    %199 = vector.shape_cast %195 : vector<8x8xf32> to vector<1x8x8xf32>
    %200 = vector.shape_cast %196 : vector<8x8xf32> to vector<1x8x8xf32>
    %201 = vector.shape_cast %197 : vector<8x8xf32> to vector<1x8x8xf32>
    %202 = tpu.concatenate %198, %199, %200, %201 in 0 : vector<1x8x8xf32>, vector<1x8x8xf32>, vector<1x8x8xf32>, vector<1x8x8xf32> -> vector<4x8x8xf32>
    %203 = vector.extract_strided_slice %184 {offsets = [0, 0], sizes = [8, 8], strides = [1, 1]} : vector<8x32xf32> to vector<8x8xf32>
    %204 = vector.extract_strided_slice %184 {offsets = [0, 8], sizes = [8, 8], strides = [1, 1]} : vector<8x32xf32> to vector<8x8xf32>
    %205 = vector.extract_strided_slice %184 {offsets = [0, 16], sizes = [8, 8], strides = [1, 1]} : vector<8x32xf32> to vector<8x8xf32>
    %206 = vector.extract_strided_slice %184 {offsets = [0, 24], sizes = [8, 8], strides = [1, 1]} : vector<8x32xf32> to vector<8x8xf32>
    %207 = vector.shape_cast %203 : vector<8x8xf32> to vector<1x8x8xf32>
    %208 = vector.shape_cast %204 : vector<8x8xf32> to vector<1x8x8xf32>
    %209 = vector.shape_cast %205 : vector<8x8xf32> to vector<1x8x8xf32>
    %210 = vector.shape_cast %206 : vector<8x8xf32> to vector<1x8x8xf32>
    %211 = tpu.concatenate %207, %208, %209, %210 in 0 : vector<1x8x8xf32>, vector<1x8x8xf32>, vector<1x8x8xf32>, vector<1x8x8xf32> -> vector<4x8x8xf32>
    "tpu.trace_start"() <{level = 10 : i32, message = "hqd,hkd->hqk"}> : () -> ()
    %cst_67 = arith.constant dense<0.000000e+00> : vector<4x8x8xf32>
    %212 = tpu.matmul %193, %202, %cst_67 {dimension_numbers = #tpu.dot_dimension_numbers<[2], [2], [1], [1], [0, 0, 0, 1, 1, 1], [0], [0]>} : vector<4x8x8xf32>, vector<4x8x8xf32>, vector<4x8x8xf32> -> vector<4x8x8xf32>
    "tpu.trace_stop"() : () -> ()
    %cst_68 = arith.constant 0.353553385 : f32
    %213 = vector.broadcast %cst_68 : f32 to vector<4x8x8xf32>
    %214 = arith.mulf %212, %213 : vector<4x8x8xf32>
    %215 = vector.shape_cast %7 : vector<8x8xf32> to vector<1x8x8xf32>
    %216 = vector.broadcast %215 : vector<1x8x8xf32> to vector<4x8x8xf32>
    %217 = arith.addf %214, %216 : vector<4x8x8xf32>
    %cst_69 = arith.constant dense<0xFF800000> : vector<4x8xf32>
    %218 = vector.multi_reduction <maximumf>, %217, %cst_69 [2] : vector<4x8x8xf32> to vector<4x8xf32>
    %219 = vector.shape_cast %218 : vector<4x8xf32> to vector<4x8x1xf32>
    %220 = vector.broadcast %219 : vector<4x8x1xf32> to vector<4x8x8xf32>
    %221 = arith.subf %217, %220 : vector<4x8x8xf32>
    %222 = math.exp %221 : vector<4x8x8xf32>
    %cst_70 = arith.constant dense<0.000000e+00> : vector<4x8xf32>
    %223 = vector.multi_reduction <add>, %222, %cst_70 [2] : vector<4x8x8xf32> to vector<4x8xf32>
    %224 = vector.shape_cast %223 : vector<4x8xf32> to vector<4x8x1xf32>
    %225 = tpu.reciprocal %224 {approx = true} : vector<4x8x1xf32> -> vector<4x8x1xf32>
    %226 = vector.broadcast %225 : vector<4x8x1xf32> to vector<4x8x8xf32>
    %227 = arith.mulf %222, %226 : vector<4x8x8xf32>
    "tpu.trace_start"() <{level = 10 : i32, message = "hqk,hkd->hqd"}> : () -> ()
    %cst_71 = arith.constant dense<0.000000e+00> : vector<4x8x8xf32>
    %228 = tpu.matmul %227, %211, %cst_71 {dimension_numbers = #tpu.dot_dimension_numbers<[2], [1], [1], [2], [0, 0, 0, 1, 1, 2], [0], [0]>} : vector<4x8x8xf32>, vector<4x8x8xf32>, vector<4x8x8xf32> -> vector<4x8x8xf32>
    "tpu.trace_stop"() : () -> ()
    %229 = vector.extract_strided_slice %228 {offsets = [0, 0, 0], sizes = [1, 8, 8], strides = [1, 1, 1]} : vector<4x8x8xf32> to vector<1x8x8xf32>
    %230 = vector.shape_cast %229 : vector<1x8x8xf32> to vector<8x8xf32>
    %231 = vector.extract_strided_slice %228 {offsets = [1, 0, 0], sizes = [1, 8, 8], strides = [1, 1, 1]} : vector<4x8x8xf32> to vector<1x8x8xf32>
    %232 = vector.shape_cast %231 : vector<1x8x8xf32> to vector<8x8xf32>
    %233 = vector.extract_strided_slice %228 {offsets = [2, 0, 0], sizes = [1, 8, 8], strides = [1, 1, 1]} : vector<4x8x8xf32> to vector<1x8x8xf32>
    %234 = vector.shape_cast %233 : vector<1x8x8xf32> to vector<8x8xf32>
    %235 = vector.extract_strided_slice %228 {offsets = [3, 0, 0], sizes = [1, 8, 8], strides = [1, 1, 1]} : vector<4x8x8xf32> to vector<1x8x8xf32>
    %236 = vector.shape_cast %235 : vector<1x8x8xf32> to vector<8x8xf32>
    %237 = tpu.concatenate %230, %232, %234, %236 in 1 : vector<8x8xf32>, vector<8x8xf32>, vector<8x8xf32>, vector<8x8xf32> -> vector<8x32xf32>
    %c1_72 = arith.constant 1 : index
    %c0_73 = arith.constant 0 : index
    %c0_74 = arith.constant 0 : index
    %238 = vector.load %arg5[%c1_72, %c0_73, %c0_74] : memref<2x32x32xf32, #tpu.memory_space<vmem>>, vector<1x32x32xf32>
    %239 = vector.shape_cast %238 : vector<1x32x32xf32> to vector<32x32xf32>
    %cst_75 = arith.constant dense<0.000000e+00> : vector<8x32xf32>
    %240 = tpu.matmul %237, %239, %cst_75 {dimension_numbers = #tpu.dot_dimension_numbers<[1], [0], [0], [1], [0, 0, 1, 1], [], []>} : vector<8x32xf32>, vector<32x32xf32>, vector<8x32xf32> -> vector<8x32xf32>
    %c1_76 = arith.constant 1 : index
    %c0_77 = arith.constant 0 : index
    %c0_78 = arith.constant 0 : index
    %241 = vector.load %arg6[%c1_76, %c0_77, %c0_78] : memref<2x1x32xf32, #tpu.memory_space<vmem>>, vector<1x1x32xf32>
    %242 = vector.shape_cast %241 : vector<1x1x32xf32> to vector<1x32xf32>
    %243 = vector.broadcast %242 : vector<1x32xf32> to vector<8x32xf32>
    %244 = arith.addf %240, %243 : vector<8x32xf32>
    %245 = arith.addf %150, %244 : vector<8x32xf32>
    %c1_79 = arith.constant 1 : index
    %c0_80 = arith.constant 0 : index
    %c0_81 = arith.constant 0 : index
    %246 = vector.load %arg7[%c1_79, %c0_80, %c0_81] : memref<2x1x32xf32, #tpu.memory_space<vmem>>, vector<1x1x32xf32>
    %247 = vector.shape_cast %246 : vector<1x1x32xf32> to vector<1x32xf32>
    %c1_82 = arith.constant 1 : index
    %c0_83 = arith.constant 0 : index
    %c0_84 = arith.constant 0 : index
    %248 = vector.load %arg8[%c1_82, %c0_83, %c0_84] : memref<2x1x32xf32, #tpu.memory_space<vmem>>, vector<1x1x32xf32>
    %249 = vector.shape_cast %248 : vector<1x1x32xf32> to vector<1x32xf32>
    %cst_85 = arith.constant dense<0.000000e+00> : vector<8xf32>
    %250 = vector.multi_reduction <add>, %245, %cst_85 [1] : vector<8x32xf32> to vector<8xf32>
    %251 = vector.shape_cast %250 : vector<8xf32> to vector<8x1xf32>
    %cst_86 = arith.constant 3.200000e+01 : f32
    %252 = vector.broadcast %cst_86 : f32 to vector<8x1xf32>
    %253 = arith.divf %251, %252 : vector<8x1xf32>
    %254 = vector.broadcast %253 : vector<8x1xf32> to vector<8x32xf32>
    %255 = arith.subf %245, %254 : vector<8x32xf32>
    %256 = vector.broadcast %253 : vector<8x1xf32> to vector<8x32xf32>
    %257 = arith.subf %245, %256 : vector<8x32xf32>
    %258 = arith.mulf %255, %257 : vector<8x32xf32>
    %cst_87 = arith.constant dense<0.000000e+00> : vector<8xf32>
    %259 = vector.multi_reduction <add>, %258, %cst_87 [1] : vector<8x32xf32> to vector<8xf32>
    %260 = vector.shape_cast %259 : vector<8xf32> to vector<8x1xf32>
    %cst_88 = arith.constant 3.200000e+01 : f32
    %261 = vector.broadcast %cst_88 : f32 to vector<8x1xf32>
    %262 = arith.divf %260, %261 : vector<8x1xf32>
    %263 = vector.broadcast %253 : vector<8x1xf32> to vector<8x32xf32>
    %264 = arith.subf %245, %263 : vector<8x32xf32>
    %cst_89 = arith.constant 9.99999974E-6 : f32
    %265 = vector.broadcast %cst_89 : f32 to vector<8x1xf32>
    %266 = arith.addf %262, %265 : vector<8x1xf32>
    %267 = math.sqrt %266 : vector<8x1xf32>
    %268 = vector.broadcast %267 : vector<8x1xf32> to vector<8x32xf32>
    %269 = arith.divf %264, %268 : vector<8x32xf32>
    %270 = vector.broadcast %247 : vector<1x32xf32> to vector<8x32xf32>
    %271 = arith.mulf %269, %270 : vector<8x32xf32>
    %272 = vector.broadcast %249 : vector<1x32xf32> to vector<8x32xf32>
    %273 = arith.addf %271, %272 : vector<8x32xf32>
    %c1_90 = arith.constant 1 : index
    %c0_91 = arith.constant 0 : index
    %c0_92 = arith.constant 0 : index
    %274 = vector.load %arg9[%c1_90, %c0_91, %c0_92] : memref<2x32x64xf32, #tpu.memory_space<vmem>>, vector<1x32x64xf32>
    %275 = vector.shape_cast %274 : vector<1x32x64xf32> to vector<32x64xf32>
    %cst_93 = arith.constant dense<0.000000e+00> : vector<8x64xf32>
    %276 = tpu.matmul %273, %275, %cst_93 {dimension_numbers = #tpu.dot_dimension_numbers<[1], [0], [0], [1], [0, 0, 1, 1], [], []>} : vector<8x32xf32>, vector<32x64xf32>, vector<8x64xf32> -> vector<8x64xf32>
    %cst_94 = arith.constant 5.000000e-01 : f32
    %277 = vector.broadcast %cst_94 : f32 to vector<8x64xf32>
    %278 = arith.mulf %277, %276 : vector<8x64xf32>
    %cst_95 = arith.constant 4.471500e-02 : f32
    %279 = vector.broadcast %cst_95 : f32 to vector<8x64xf32>
    %280 = arith.mulf %279, %276 : vector<8x64xf32>
    %281 = arith.mulf %280, %276 : vector<8x64xf32>
    %282 = arith.mulf %281, %276 : vector<8x64xf32>
    %283 = arith.addf %276, %282 : vector<8x64xf32>
    %cst_96 = arith.constant 0.797884583 : f32
    %284 = vector.broadcast %cst_96 : f32 to vector<8x64xf32>
    %285 = arith.mulf %284, %283 : vector<8x64xf32>
    %286 = math.tanh %285 : vector<8x64xf32>
    %cst_97 = arith.constant 1.000000e+00 : f32
    %287 = vector.broadcast %cst_97 : f32 to vector<8x64xf32>
    %288 = arith.addf %287, %286 : vector<8x64xf32>
    %289 = arith.mulf %278, %288 : vector<8x64xf32>
    %c1_98 = arith.constant 1 : index
    %c0_99 = arith.constant 0 : index
    %c0_100 = arith.constant 0 : index
    %290 = vector.load %arg10[%c1_98, %c0_99, %c0_100] : memref<2x64x32xf32, #tpu.memory_space<vmem>>, vector<1x64x32xf32>
    %291 = vector.shape_cast %290 : vector<1x64x32xf32> to vector<64x32xf32>
    %cst_101 = arith.constant dense<0.000000e+00> : vector<8x32xf32>
    %292 = tpu.matmul %289, %291, %cst_101 {dimension_numbers = #tpu.dot_dimension_numbers<[1], [0], [0], [1], [0, 0, 1, 1], [], []>} : vector<8x64xf32>, vector<64x32xf32>, vector<8x32xf32> -> vector<8x32xf32>
    %293 = arith.addf %245, %292 : vector<8x32xf32>
    %c0_102 = arith.constant 0 : index
    %c0_103 = arith.constant 0 : index
    %294 = vector.load %arg11[%c0_102, %c0_103] : memref<32x64xf32, #tpu.memory_space<vmem>>, vector<32x64xf32>
    %cst_104 = arith.constant dense<0.000000e+00> : vector<8x64xf32>
    %295 = tpu.matmul %293, %294, %cst_104 {dimension_numbers = #tpu.dot_dimension_numbers<[1], [0], [0], [1], [0, 0, 1, 1], [], []>} : vector<8x32xf32>, vector<32x64xf32>, vector<8x64xf32> -> vector<8x64xf32>
    %c0_105 = arith.constant 0 : index
    %c0_106 = arith.constant 0 : index
    %c0_107 = arith.constant 0 : index
    %296 = vector.load %arg12[%c0_105, %c0_106, %c0_107] : memref<1x8x64xf32, #tpu.memory_space<vmem>>, vector<1x8x64xf32>
    %297 = vector.shape_cast %296 : vector<1x8x64xf32> to vector<8x64xf32>
    %298 = vector.shape_cast %295 : vector<8x64xf32> to vector<1x8x64xf32>
    tpu.vector_store %arg12[%c0_105, %c0_106, %c0_107], %298 {strides = array<i32>} : memref<1x8x64xf32, #tpu.memory_space<vmem>>, vector<1x8x64xf32>,
    return
  }
  func.func @transform_0(%arg0: i32) -> (i32, i32, i32) {
    %c0_i32 = arith.constant 0 : i32
    %c0_i32_0 = arith.constant 0 : i32
    %c0_i32_1 = arith.constant 0 : i32
    return %arg0, %c0_i32, %c0_i32_0 : i32, i32, i32
  }
  func.func @transform_1(%arg0: i32) -> (i32, i32, i32) {
    %c0_i32 = arith.constant 0 : i32
    %c0_i32_0 = arith.constant 0 : i32
    %c0_i32_1 = arith.constant 0 : i32
    %c0_i32_2 = arith.constant 0 : i32
    return %c0_i32, %c0_i32_0, %c0_i32_1 : i32, i32, i32
  }
  func.func @transform_2(%arg0: i32) -> (i32, i32, i32) {
    %c0_i32 = arith.constant 0 : i32
    %c0_i32_0 = arith.constant 0 : i32
    %c0_i32_1 = arith.constant 0 : i32
    %c0_i32_2 = arith.constant 0 : i32
    return %c0_i32, %c0_i32_0, %c0_i32_1 : i32, i32, i32
  }
  func.func @transform_3(%arg0: i32) -> (i32, i32, i32) {
    %c0_i32 = arith.constant 0 : i32
    %c0_i32_0 = arith.constant 0 : i32
    %c0_i32_1 = arith.constant 0 : i32
    %c0_i32_2 = arith.constant 0 : i32
    return %c0_i32, %c0_i32_0, %c0_i32_1 : i32, i32, i32
  }
  func.func @transform_4(%arg0: i32) -> (i32, i32, i32) {
    %c0_i32 = arith.constant 0 : i32
    %c0_i32_0 = arith.constant 0 : i32
    %c0_i32_1 = arith.constant 0 : i32
    %c0_i32_2 = arith.constant 0 : i32
    return %c0_i32, %c0_i32_0, %c0_i32_1 : i32, i32, i32
  }
  func.func @transform_5(%arg0: i32) -> (i32, i32, i32) {
    %c0_i32 = arith.constant 0 : i32
    %c0_i32_0 = arith.constant 0 : i32
    %c0_i32_1 = arith.constant 0 : i32
    %c0_i32_2 = arith.constant 0 : i32
    return %c0_i32, %c0_i32_0, %c0_i32_1 : i32, i32, i32
  }
  func.func @transform_6(%arg0: i32) -> (i32, i32, i32) {
    %c0_i32 = arith.constant 0 : i32
    %c0_i32_0 = arith.constant 0 : i32
    %c0_i32_1 = arith.constant 0 : i32
    %c0_i32_2 = arith.constant 0 : i32
    return %c0_i32, %c0_i32_0, %c0_i32_1 : i32, i32, i32
  }
  func.func @transform_7(%arg0: i32) -> (i32, i32, i32) {
    %c0_i32 = arith.constant 0 : i32
    %c0_i32_0 = arith.constant 0 : i32
    %c0_i32_1 = arith.constant 0 : i32
    %c0_i32_2 = arith.constant 0 : i32
    return %c0_i32, %c0_i32_0, %c0_i32_1 : i32, i32, i32
  }
  func.func @transform_8(%arg0: i32) -> (i32, i32, i32) {
    %c0_i32 = arith.constant 0 : i32
    %c0_i32_0 = arith.constant 0 : i32
    %c0_i32_1 = arith.constant 0 : i32
    %c0_i32_2 = arith.constant 0 : i32
    return %c0_i32, %c0_i32_0, %c0_i32_1 : i32, i32, i32
  }
  func.func @transform_9(%arg0: i32) -> (i32, i32, i32) {
    %c0_i32 = arith.constant 0 : i32
    %c0_i32_0 = arith.constant 0 : i32
    %c0_i32_1 = arith.constant 0 : i32
    %c0_i32_2 = arith.constant 0 : i32
    return %c0_i32, %c0_i32_0, %c0_i32_1 : i32, i32, i32
  }
  func.func @transform_10(%arg0: i32) -> (i32, i32) {
    %c0_i32 = arith.constant 0 : i32
    %c0_i32_0 = arith.constant 0 : i32
    %c0_i32_1 = arith.constant 0 : i32
    return %c0_i32, %c0_i32_0 : i32, i32
  }
  func.func @transform_11(%arg0: i32) -> (i32, i32, i32) {
    %c0_i32 = arith.constant 0 : i32
    %c0_i32_0 = arith.constant 0 : i32
    %c0_i32_1 = arith.constant 0 : i32
    return %arg0, %c0_i32, %c0_i32_0 : i32, i32, i32
  }
}

</mosaic_0001>

<bundles_post_ra>
// kernel: tpu_custom_call.1
= control target key start
LH: loop header
LB: loop body
LE: loop exit
PB: predicated region body
PF: predicated region fallthrough
CT: control target
= control target key end

     0   :  { %s4413_s0 = inlined_call_operand.hbm [shape: f32[2,8,32], index: 0, kind: input, shape index: {}]   ;;  %s4414_s1 = inlined_call_operand.vmem [shape: f32[2,1,32], index: 1, kind: input, shape index: {}]   ;;  %s4415_s2 = inlined_call_operand.hbm [shape: f32[2,1,32], index: 2, kind: input, shape index: {}]   ;;  %s4416_s3 = inlined_call_operand.vmem [shape: f32[2,32,96], index: 3, kind: input, shape index: {}]   ;;  %s4417_s4 = inlined_call_operand.vmem [shape: f32[2,32,32], index: 4, kind: input, shape index: {}]   ;;  %s4418_s5 = inlined_call_operand.hbm [shape: f32[2,1,32], index: 5, kind: input, shape index: {}]   ;;  %s4419_s6 = inlined_call_operand.hbm [shape: f32[2,1,32], index: 6, kind: input, shape index: {}]   ;;  %s4420_s7 = inlined_call_operand.hbm [shape: f32[2,1,32], index: 7, kind: input, shape index: {}]   ;;  %s4421_s8 = inlined_call_operand.vmem [shape: f32[2,32,64], index: 8, kind: input, shape index: {}]   ;;  %s4422_s9 = inlined_call_operand.vmem [shape: f32[2,64,32], index: 9, kind: input, shape index: {}]   ;;  %s4423_s10 = inlined_call_operand.vmem [shape: f32[32,64], index: 10, kind: input, shape index: {}]   ;;  %s4424_s11 = inlined_call_operand.hbm [shape: f32[2,8,64], index: 11, kind: output, shape index: {}]  }
   0x1   :  { %4437 = sst [smem:[#allocation16_spill]] %s4415_s2 }
   0x2   :  { %4438 = sst [smem:[#allocation17_spill]] %s4422_s9 }
   0x3   :  { %4439 = sst [smem:[#allocation18_spill]] %s4423_s10 }
   0x4   :  { %4440 = sst [smem:[#allocation19_spill]] %s4424_s11 }
   0x5   :  { %16 = vsyncpa [#allocation3], 0 }
   0x6   :  { %18 = vsyncpa [#allocation3 + $0x1], 0 }
   0x7   :  { %19 = vsyncpa [#allocation6], 0 }
   0x8   :  { %20 = vsyncpa [#allocation9], 0 }
   0x9   :  { %21 = vsyncpa [#allocation4], 0 }
   0xa   :  { %23 = vsyncpa [#allocation4 + $0x1], 0  ;;  %s3731_s17 = smov 0   ;;  %s3733_s18 = smov 0  }
   0xb   :  { %s3735_s19 = smov 0   ;;  %s3737_s20 = smov 0  }
   0xc LB: > { %s3651_s21 = smov [#allocation5]   ;;  %s3752_s23 = sadd.s32 4294967295, %s3649_s20   ;;  %s3649_s20 = sphi %s3737_s20, %s4470_s20   ;;  %s3645_s19 = sphi %s3735_s19, %s4469_s19   ;;  %s3641_s18 = sphi %s3733_s18, %s4468_s18   ;;  %s3637_s17 = sphi %s3731_s17, %s4467_s17  }
   0xd   : > { %s311_s22 = sshll.u32 %s3651_s21, 4  ;;  %p2851_p0 = scmp.ge.s32.totalorder %s3649_s20, 1  ;;  %s3757_s22 = int_to_ptr.vmem [resolvable:$true] %s311_s22 }
   0xe   : > { %p4428_p1 = scmp.eq.s32.totalorder %s3752_s23, 0  ;;  %p296_p2 = scmp.lt.s32.totalorder %s3649_s20, 3 }
   0xf   : > { %s3652_s25 = smov [#allocation8]   ;;  %s3653_s28 = smov [#allocation7]  }
  0x10   : > { %p3759_p3 = pnand %p2851_p0, %p296_p2  ;;  %s343_s26 = sshll.u32 %s3652_s25, 4  ;;  %s3772_s26 = int_to_ptr.vmem [resolvable:$true] %s343_s26 }
  0x11   : > { %s330_s29 = sshll.u32 %s3653_s28, 4  ;;  %s4443_s2 = sld [smem:[#allocation16_spill]]  ;;  %s3774_s29 = int_to_ptr.vmem [resolvable:$true] %s330_s29 }
  0x12   : > { %s4441_s24 = scalar_select %p3759_p3, 1, 0 }
  0x13   : > { %p3300_p5 = pneg %p3759_p3 }
  0x15   : > { %p3768_p6 = pnand %p3300_p5, %p4428_p1 }
  0x17   : > { %s3433_s13 = scalar_lea.hbm %s4443_s2, 32  ;;  %p3784_p8 = pneg %p3768_p6 }
  0x18   : > { %p3434_p7 = scmp.ne.s32.totalorder %s4443_s2, %s3433_s13  ;;  %p3440_p11 = scmp.lt.u32.totalorder %s3433_s13, %s4443_s2 }
  0x1a   : > { %p3436_p9 = pnand %p3784_p8, %p3434_p7 }
  0x1c   : > { %p3437_p10 = pneg %p3436_p9 }
  0x1e   : > { %p3442_p12 = pnand %p3440_p11, %p3437_p10 }
  0x20   : > { %3445 = shalt.err (!%p3442_p12)
}
  0x21   : > { %s3446_s28 = scalar_lea.vmem %s3757_s22, 32  ;;  %p3454_p5 = scmp.lt.s32.totalorder %s3757_s22, %s3757_s22 }
  0x22   : > { %p3447_p13 = scmp.ne.s32.totalorder %s3757_s22, %s3446_s28  ;;  %p3455_p4 = scmp.lt.s32.totalorder %s3446_s28, %s3446_s28 }
  0x24   : > { %p3449_p0 = pnand %p3447_p13, %p3784_p8  ;;  %p3456_p7 = por %p3455_p4, %p3454_p5 }
  0x26   : > { %p3450_p2 = pneg %p3449_p0 }
  0x28   : > { %p3457_p9 = pnand %p3456_p7, %p3450_p2 }
  0x2a   : > { %3460 = shalt.err (!%p3457_p9)
}
  0x2b   : > { %s3654_s30 = smov 16   ;;  %s3655_s12 = smov 1  }
  0x2c   : > { %3303 = dma.hbm_to_vmem [thread:$0]  (!%p3768_p6), %s4443_s2, 32, %s3757_s22, [#allocation6], %s3654_s30, %s3654_s30, %s3655_s12  }
  0x2d   : > { %s3461_s25 = scalar_lea.hbm %s4419_s6, 32 }
  0x2e   : > { %p3462_p4 = scmp.ne.s32.totalorder %s4419_s6, %s3461_s25  ;;  %p3468_p12 = scmp.lt.u32.totalorder %s3461_s25, %s4419_s6 }
  0x30   : > { %p3464_p10 = pnand %p3462_p4, %p3784_p8 }
  0x32   : > { %p3465_p11 = pneg %p3464_p10 }
  0x34   : > { %p3470_p13 = pnand %p3468_p12, %p3465_p11 }
  0x36   : > { %3473 = shalt.err (!%p3470_p13)
}
  0x37   : > { %s3474_s22 = scalar_lea.vmem %s3772_s26, 32  ;;  %p3482_p7 = scmp.lt.s32.totalorder %s3772_s26, %s3772_s26 }
  0x38   : > { %p3475_p0 = scmp.ne.s32.totalorder %s3772_s26, %s3474_s22  ;;  %p3483_p9 = scmp.lt.s32.totalorder %s3474_s22, %s3474_s22 }
  0x3a   : > { %p3477_p2 = pnand %p3475_p0, %p3784_p8  ;;  %p3484_p4 = por %p3483_p9, %p3482_p7 }
  0x3c   : > { %p3478_p5 = pneg %p3477_p2 }
  0x3e   : > { %p3485_p10 = pnand %p3484_p4, %p3478_p5 }
  0x40   : > { %3488 = shalt.err (!%p3485_p10)
}
  0x41   : > { %3309 = dma.hbm_to_vmem [thread:$0]  (!%p3768_p6), %s4419_s6, 32, %s3772_s26, [#allocation9], %s3654_s30, %s3654_s30, %s3655_s12  }
  0x42   : > { %s3489_s14 = scalar_lea.hbm %s4418_s5, 32 }
  0x43   : > { %p3490_p11 = scmp.ne.s32.totalorder %s4418_s5, %s3489_s14  ;;  %p3496_p0 = scmp.lt.u32.totalorder %s3489_s14, %s4418_s5 }
  0x45   : > { %p3492_p12 = pnand %p3490_p11, %p3784_p8 }
  0x47   : > { %p3493_p13 = pneg %p3492_p12 }
  0x49   : > { %p3498_p2 = pnand %p3496_p0, %p3493_p13 }
  0x4b   : > { %3501 = shalt.err (!%p3498_p2)
}
  0x4c   : > { %s3502_s26 = scalar_lea.vmem %s3774_s29, 32  ;;  %p3510_p4 = scmp.lt.s32.totalorder %s3774_s29, %s3774_s29 }
  0x4d   : > { %p3503_p5 = scmp.ne.s32.totalorder %s3774_s29, %s3502_s26  ;;  %p3511_p10 = scmp.lt.s32.totalorder %s3502_s26, %s3502_s26 }
  0x4f   : > { %p3505_p7 = pnand %p3503_p5, %p3784_p8  ;;  %p3512_p11 = por %p3511_p10, %p3510_p4 }
  0x51   : > { %p3506_p9 = pneg %p3505_p7 }
  0x53   : > { %p3513_p12 = pnand %p3512_p11, %p3506_p9 }
  0x55   : > { %3516 = shalt.err (!%p3513_p12)
}
  0x56   : > { %3306 = dma.hbm_to_vmem [thread:$0]  (!%p3768_p6), %s4418_s5, 32, %s3774_s29, [#allocation6], %s3654_s30, %s3654_s30, %s3655_s12  }
  0x57   : > { %s3656_s10 = smov [#allocation10]   ;;  %s3517_s15 = scalar_lea.hbm %s4420_s7, 32 }
  0x58   : > { %s356_s11 = sshll.u32 %s3656_s10, 4  ;;  %p3518_p13 = scmp.ne.s32.totalorder %s4420_s7, %s3517_s15  ;;  %s357_s11 = int_to_ptr.vmem [resolvable:$true] %s356_s11 }
  0x59   : > { %p3524_p5 = scmp.lt.u32.totalorder %s3517_s15, %s4420_s7 }
  0x5a   : > { %p3520_p0 = pnand %p3518_p13, %p3784_p8 }
  0x5c   : > { %p3521_p2 = pneg %p3520_p0 }
  0x5e   : > { %p3526_p7 = pnand %p3524_p5, %p3521_p2 }
  0x60   : > { %3529 = shalt.err (!%p3526_p7)
}
  0x61   : > { %s3530_s29 = scalar_lea.vmem %s357_s11, 32  ;;  %p3538_p11 = scmp.lt.s32.totalorder %s357_s11, %s357_s11 }
  0x62   : > { %p3531_p9 = scmp.ne.s32.totalorder %s357_s11, %s3530_s29  ;;  %p3539_p12 = scmp.lt.s32.totalorder %s3530_s29, %s3530_s29 }
  0x64   : > { %p3533_p4 = pnand %p3531_p9, %p3784_p8  ;;  %p3540_p1 = por %p3539_p12, %p3538_p11 }
  0x66   : > { %p3534_p10 = pneg %p3533_p4 }
  0x68   : > { %p3541_p3 = pnand %p3540_p1, %p3534_p10 }
  0x6a   : > { %3544 = shalt.err (!%p3541_p3)
}
  0x6b   : > { %3312 = dma.hbm_to_vmem [thread:$0]  (!%p3768_p6), %s4420_s7, 32, %s357_s11, [#allocation9], %s3654_s30, %s3654_s30, %s3655_s12  }
  0x6c   : > { %s2850_s27 = sadd.s32 4294967294, %s3649_s20   ;;  %s3883_s16 = sadd.s32 1, %s3649_s20  }
  0x6d   : > { %s33_s10 = ssub.s32 %s3649_s20, %s3883_s16  ;;  %s36_s13 = sadd.s32 1, %s3645_s19 }
  0x6e   : > { %p34_p1 = scmp.eq.s32.totalorder %s33_s10, 0  ;;  %p43_p3 = scmp.ne.s32.totalorder %s3645_s19, %s3641_s18 }
  0x6f   : > { %p44_p8 = scmp.eq.s32.totalorder %s3649_s20, 0  ;;  %p49_p13 = scmp.ne.s32.totalorder %s3641_s18, %s3637_s17 }
  0x70   : > { %s3894_s14 = scalar_select %p34_p1, %s3645_s19, %s36_s13  }
  0x71   : > { %p3896_p0 = por %p44_p8, %p43_p3  ;;  %p4446_p2 = scmp.eq.s32.totalorder %s3752_s23, 0 }
  0x72   : > { %p283_p5 = scmp.eq.s32.totalorder %s3752_s23, 1  ;;  %p289_p7 = scmp.eq.s32.totalorder %s2850_s27, 1 }
  0x73   : > { %p3902_p6 = por %p4446_p2, %p49_p13  ;;  %p3325_p9 = scmp.lt.s32.totalorder %s3649_s20, 2 }
  0x74   : > { %s379_s12 = sand.u32 1, %s3645_s19   ;;  %p3909_p4 = por %p283_p5, %p43_p3 }
  0x75   : > { %p3913_p10 = por %p289_p7, %p49_p13  ;;  %s2857_s25 = sshll.u32 %s379_s12, 3 }
  0x76   : > { %s4448_s11 = scalar_select %p3909_p4, 1, 0 }
  0x77   : > { %s4449_s21 = scalar_select %p3913_p10, 1, 0 }
  0x78   : > { %s2858_s28 = sshll.u32 %s3649_s20, 7  ;;  %s383_s9 = scalar_lea.vmem [#allocation2], %s2857_s25 }
  0x79   : > { %s3921_s22 = scalar_lea.hbm %s4413_s0, %s2858_s28  ;;  %s390_s27 = sshll.u32 %s383_s9, 4  ;;  %s3923_s27 = int_to_ptr.vmem [resolvable:$true] %s390_s27 }
  0x7a   : > { %p3927_p11 = pnand %p3325_p9, %p3896_p0  ;;  %s380_s13 = scalar_lea.sflag [#allocation3], %s379_s12 }
  0x7b   : > { %s3545_s2 = scalar_lea.hbm %s3921_s22, 128  ;;  %s3550_s26 = scalar_lea.hbm %s4413_s0, 256 }
  0x7c   : > { %p3546_p12 = scmp.ne.s32.totalorder %s3921_s22, %s3545_s2  ;;  %p3547_p1 = pneg %p3927_p11 }
  0x7d   : > { %p3551_p13 = scmp.lt.u32.totalorder %s3921_s22, %s4413_s0  ;;  %p3552_p0 = scmp.lt.u32.totalorder %s3550_s26, %s3545_s2 }
  0x7e   : > { %p3548_p3 = pnand %p3547_p1, %p3546_p12  ;;  %p3554_p5 = scmp.lt.u32.totalorder %s3545_s2, %s3921_s22 }
  0x7f   : > { %p3553_p2 = por %p3552_p0, %p3551_p13 }
  0x80   : > { %p3549_p8 = pneg %p3548_p3 }
  0x81   : > { %p3555_p7 = por %p3554_p5, %p3553_p2 }
  0x83   : > { %p3556_p9 = pnand %p3555_p7, %p3549_p8 }
  0x85   : > { %3559 = shalt.err (!%p3556_p9)
}
  0x86   : > { %s3560_s12 = scalar_lea.vmem %s3923_s27, 128  ;;  %s3657_s9 = smov [#allocation2]  }
  0x87   : > { %p3561_p12 = scmp.ne.s32.totalorder %s3923_s27, %s3560_s12  ;;  %s3565_s25 = sshll.u32 %s3657_s9, 4  ;;  %s3566_s25 = int_to_ptr.vmem [resolvable:$false] %s3565_s25 }
  0x88   : > { %s3567_s28 = scalar_lea.vmem %s3566_s25, 256  ;;  %p3568_p4 = scmp.lt.s32.totalorder %s3923_s27, %s3566_s25 }
  0x89   : > { %p3563_p3 = pnand %p3561_p12, %p3547_p1  ;;  %p3569_p13 = scmp.lt.s32.totalorder %s3567_s28, %s3560_s12 }
  0x8b   : > { %p3564_p10 = pneg %p3563_p3  ;;  %p3570_p0 = por %p3569_p13, %p3568_p4 }
  0x8d   : > { %p3571_p2 = pnand %p3570_p0, %p3564_p10 }
  0x8f   : > { %3574 = shalt.err (!%p3571_p2)
}
  0x90   : > { %3316 = dma.hbm_to_vmem [thread:$0]  (!%p3927_p11), %s3921_s22, 128, %s3923_s27, %s380_s13  }
  0x91   : > { %p4451_p8 = scmp.ne.s32.totalorder %s4441_s24, 0 }
  0x92   : > { %s3959_s2 = sand.u32 (!%p4451_p8), 1, %s3641_s18  }
  0x93   : > { %399 = sbr.rel (%p4451_p8) target bundleno = 5652 (0x1614), region = 64  ;;  %s4431_s26 = sshll.u32 (!%p4451_p8), %s3959_s2, 3 }
  0x94   : > { %s402_s15 = scalar_lea.sflag (!%p4451_p8), [#allocation3], %s3959_s2  ;;  %s405_s29 = scalar_lea.vmem (!%p4451_p8), [#allocation2], %s4431_s26 }
  0x9a   : > { %3620 = dma.done.wait (%p3902_p6), %s402_s15, 128  }
  0x9b   : > { %3622 = vsyncadd (%p3902_p6), %s402_s15, 4294967168  ;;  %p4452_p4 = scmp.eq.s32.totalorder %s3752_s23, 0 }
  0x9d   : > { %3624 = dma.done.wait (%p4452_p4), [#allocation6], 64   ;;  %p4453_p10 = pmov %p4452_p4 }
  0x9e   : > { %p4454_p11 = pmov %p4452_p4 }
  0x9f   : > { %3626 = vsyncadd (%p4453_p10), [#allocation6], 4294967232 }
  0xa0   : > { %3628 = dma.done.wait (%p4454_p11), [#allocation9], 64   ;;  %p4455_p1 = pmov %p4452_p4 }
  0xa1   : > { %vm469_vm0 = vcmask 261120   ;;  %v3977_v0 = vld [vmem:[%s405_s29] sm:$0xff]  ;;  %v507_v9 = vld [vmem:[%s4416_s3 + $0x10] sm:$0xff]  ;;  %v3658_v10 = vmov 0.0|0.0   ;;  %v508_v12 = vld [vmem:[%s4416_s3 + $0x18] sm:$0xff]  ;;  %vm3659_vm1 = vmmov 0   ;;  %v461_v38 = vlaneseq }
  0xa2   : > { %3630 = vsyncadd (%p4455_p1), [#allocation9], 4294967232  ;;  %v470_v1 = vsel %vm469_vm0, %v3977_v0, 0.0  ;;  %v505_v7 = vld [vmem:[%s4416_s3] sm:$0xff]  ;;  %v506_v8 = vld [vmem:[%s4416_s3 + $0x8] sm:$0xff]  ;;  %3214 = vmatprep.subr.bf16.mxu0 %v3658_v10  ;;  %v3660_v13 = vmov 0.0   ;;  %v3218_v14 = vpack.c.bf16 %v508_v12, %v507_v9 }
  0xa3   : > { %471 = vadd.xlane.f32.xlu0 %v470_v1  ;;  %v3215_v11 = vpack.c.bf16 %v506_v8, %v505_v7  ;;  %3027 = vmatprep.mubr.msk.f32.mxu0 %vm3659_vm1, %v3660_v13  ;;  %v2866_v24 = vld [vmem:[%s4414_s1] ss:$0 sm:$0xff]  ;;  %v2867_v26 = vld [vmem:[#allocation5] ss:$0 sm:$0xff]  ;;  %s3661_s15 = smov 104   ;;  %s3662_s29 = smov 120  }
  0xa4   : > { %3030 = vmatprep.subr.mxu1 %v3660_v13  ;;  %3032 = vmatprep.mubr.msk.f32.mxu1 %vm3659_vm1, %v3660_v13  ;;  %s3663_s24 = smov 112   ;;  %s3664_s30 = smov 96   ;;  %vm591_vm4 = vcmask 64512   ;;  %v462_v39 = vshrl.u32 %v461_v38, 7  ;;  %v464_v40 = vand.u32 127, %v461_v38  ;;  %vm1263_vm6 = vcmask 130048  }
  0xa5   : > { %3216 = vmatpush3.bf16.msra.mxu0 %v3215_v11  ;;  %v3665_v42 = vmov -1e+30   ;;  %s4435_s22 = smov 64   ;;  %s4434_s27 = smov 8   ;;  %vm1265_vm7 = vcmask 195584   ;;  %vm1482_vm10 = vcmask 523264  }
  0xa6   : > { %3217 = vmatprep.subr.bf16.mxu0 %v3658_v10  ;;  %vm465_vm5 = vcmp.le.s32.totalorder %v464_v40, %v462_v39  ;;  %v1267_v40 = vld [vmem:[%s4417_s4] sm:$0xff]  ;;  %s4433_s10 = smov 16   ;;  %s4432_s13 = smov 24  }
  0xa7   : > { %v4055_v43 = vsel %vm465_vm5, 0.0, %v3665_v42  ;;  %s4458_s28 = smov 8   ;;  %s4463_s26 = sld [smem:[#allocation19_spill]] }
  0xa8   : > { %s2729_s9 = scalar_lea.sflag [#allocation4], %s3959_s2  ;;  %p4464_p5 = scmp.ne.s32.totalorder %s4448_s11, 0 }
  0xa9   : > { %3219 = vmatpush3.bf16.msra.mxu0 %v3218_v14 }
  0xaa   : > { %3050 = vmatprep.subr.mxu0 %v3660_v13 }
 0x130   : > { %v472_v2 = vpop.xlane.xlu0 %471 }
 0x131   : > { %v474_v3 = vmul.f32 0.03125, %v472_v2 }
 0x133   : > { %v475_v4 = vsub.f32 %v3977_v0, %v474_v3 }
 0x135   : > { %v476_v5 = vmul.f32 %v475_v4, %v475_v4 }
 0x137   : > { %v477_v6 = vsel %vm469_vm0, %v476_v5, 0.0 }
 0x138   : > { %478 = vadd.xlane.f32.xlu0 %v477_v6 }
 0x1c5   : > { %v479_v15 = vpop.xlane.xlu0 %478 }
 0x1c6   : > { %v480_v16 = vmul.f32 0.03125, %v479_v15 }
 0x1c8   : > { %v481_v17 = vadd.f32 1e-05, %v480_v16 }
 0x1ca   : > { %3381 = vrsqrt.f32 %v481_v17  ;;  %vm484_vm2 = vcmp.eq.f32.partialorder %v481_v17, inf  ;;  %v487_v20 = vand.u32 2147483648, %v481_v17  ;;  %vm486_vm3 = vcmp.eq.f32.partialorder %v481_v17, 0.0 }
 0x1d4   : > { %v3382_v18 = vpop.eup %3381 }
 0x1d5   : > { %v483_v19 = vmul.f32 %v3382_v18, %v481_v17 }
 0x1d7   : > { %v485_v21 = vsel %vm484_vm2, %v481_v17, %v483_v19 }
 0x1d8   : > { %v488_v22 = vsel %vm486_vm3, %v487_v20, %v485_v21 }
 0x1d9   : > { %3383 = vrcp.f32 %v488_v22 }
 0x1e3   : > { %v3384_v23 = vpop.eup %3383 }
 0x1e4   : > { %v490_v25 = vmul.f32 %v3384_v23, %v475_v4 }
 0x1e6   : > { %v497_v27 = vmul.f32 %v2866_v24, %v490_v25 }
 0x1e8   : > { %v504_v28 = vadd.f32 %v2867_v26, %v497_v27 }
 0x1ea   : > { %3028 = vmatmul.mubr.msk.f32.vlgmr.msra.gmra.mrb[0].mxu0 %vm469_vm0, %v504_v28 }
 0x1eb   : > { %3052 = vmatprep.mubr.msk.f32.mxu0 %vm3659_vm1, %v3660_v13 }
 0x2bd   : > { %v4009_v29 = vpop.f32.mrb[0].mxu0 }
 0x2be   : > { %587 = vrot.lane.b32.xlu0 %v4009_v29, %s3661_s15  ;;  %583 = vrot.lane.b32.xlu1 %v4009_v29, %s3662_s29  ;;  %v3029_v30 = vpop.f32.mrb[1].mxu0 }
 0x2c2   : > { %585 = vrot.lane.b32.xlu1 %v4009_v29, %s3663_s24 }
 0x2c6   : > { %589 = vrot.lane.b32.xlu1 %v4009_v29, %s3664_s30 }
 0x330   : > { %v4019_v31 = vpop.permute.xlu1 %583  ;;  %v4027_v33 = vpop.permute.xlu0 %587 }
 0x331   : > { %666 = vrot.lane.b32.xlu1 %v4019_v31, %s3664_s30 }
 0x334   : > { %v4023_v32 = vpop.permute.xlu1 %585 }
 0x335   : > { %742 = vrot.lane.b32.xlu1 %v4023_v32, %s3664_s30 }
 0x338   : > { %v590_v34 = vpop.permute.xlu1 %589 }
 0x339   : > { %818 = vrot.lane.b32.xlu1 %v4027_v33, %s3664_s30  ;;  %3031 = vmatpush3.xpose.msk.msra.mxu1 %vm591_vm4, %v590_v34 }
 0x33a   : > { %3035 = vmatprep.subr.mxu1 %v3660_v13 }
 0x33c   : > { %3033 = vmatmul.mubr.msk.f32.vlgmr.msra.gmra.mrb[0].mxu1 %vm591_vm4, %v4009_v29 }
 0x33d   : > { %3037 = vmatprep.mubr.msk.f32.mxu1 %vm3659_vm1, %v3660_v13 }
 0x3a3   : > { %v667_v35 = vpop.permute.xlu1 %666 }
 0x3a4   : > { %3036 = vmatpush3.xpose.msk.msra.mxu1 %vm591_vm4, %v667_v35 }
 0x3a5   : > { %3040 = vmatprep.subr.mxu1 %v3660_v13 }
 0x3a7   : > { %3038 = vmatmul.mubr.msk.f32.vlgmr.msra.gmra.mrb[2].mxu1 %vm591_vm4, %v4019_v31  ;;  %v743_v36 = vpop.permute.xlu1 %742 }
 0x3a8   : > { %3041 = vmatpush3.xpose.msk.msra.mxu1 %vm591_vm4, %v743_v36  ;;  %3042 = vmatprep.mubr.msk.f32.mxu1 %vm3659_vm1, %v3660_v13 }
 0x3a9   : > { %3045 = vmatprep.subr.mxu1 %v3660_v13 }
 0x3ab   : > { %3043 = vmatmul.mubr.msk.f32.vlgmr.msra.gmra.mrb[4].mxu1 %vm591_vm4, %v4023_v32  ;;  %v819_v37 = vpop.permute.xlu1 %818 }
 0x3ac   : > { %3046 = vmatpush3.xpose.msk.msra.mxu1 %vm591_vm4, %v819_v37  ;;  %3047 = vmatprep.mubr.msk.f32.mxu1 %vm3659_vm1, %v3660_v13 }
 0x3ad   : > { %3055 = vmatprep.subr.mxu1 %v3660_v13 }
 0x3af   : > { %3048 = vmatmul.mubr.msk.f32.vlgmr.msra.gmra.mrb[6].mxu1 %vm591_vm4, %v4027_v33 }
 0x3b0   : > { %3057 = vmatprep.mubr.msk.f32.mxu1 %vm3659_vm1, %v3660_v13 }
 0x40f   : > { %v662_v41 = vpop.f32.mrb[0].mxu1 }
 0x410   : > { %v894_v44 = vmul.f32 0.35355338, %v662_v41  ;;  %v3034_v45 = vpop.f32.mrb[1].mxu1  ;;  %v1268_v41 = vld [vmem:[%s4417_s4 + $0x8] sm:$0xff] }
 0x411   : > { %v3221_v42 = vpack.c.bf16 %v1268_v41, %v1267_v40  ;;  %v1270_v45 = vld [vmem:[%s4417_s4 + $0x18] sm:$0xff] }
 0x412   : > { %v898_v46 = vadd.f32 %v894_v44, %v4055_v43  ;;  %v1269_v44 = vld [vmem:[%s4417_s4 + $0x10] sm:$0xff] }
 0x414   : > { %v902_v47 = vsel %vm591_vm4, %v898_v46, -inf }
 0x415   : > { %903 = vmax.xlane.f32.xlu1 %v902_v47 }
 0x47a   : > { %v738_v48 = vpop.f32.mrb[2].mxu1 }
 0x47b   : > { %v895_v49 = vmul.f32 0.35355338, %v738_v48  ;;  %v3039_v50 = vpop.f32.mrb[3].mxu1 }
 0x47d   : > { %v899_v51 = vadd.f32 %v895_v49, %v4055_v43 }
 0x47e   : > { %v814_v52 = vpop.f32.mrb[4].mxu1 }
 0x47f   : > { %v896_v53 = vmul.f32 0.35355338, %v814_v52  ;;  %v3044_v54 = vpop.f32.mrb[5].mxu1  ;;  %v905_v55 = vsel %vm591_vm4, %v899_v51, -inf }
 0x480   : > { %906 = vmax.xlane.f32.xlu0 %v905_v55 }
 0x481   : > { %v900_v56 = vadd.f32 %v896_v53, %v4055_v43 }
 0x482   : > { %v890_v57 = vpop.f32.mrb[6].mxu1 }
 0x483   : > { %v897_v58 = vmul.f32 0.35355338, %v890_v57  ;;  %v3049_v59 = vpop.f32.mrb[7].mxu1  ;;  %v908_v60 = vsel %vm591_vm4, %v900_v56, -inf }
 0x484   : > { %909 = vmax.xlane.f32.xlu1 %v908_v60  ;;  %v2881_v59 = vld [vmem:[#allocation7] ss:$0 sm:$0xff] }
 0x485   : > { %v901_v61 = vadd.f32 %v897_v58, %v4055_v43 }
 0x487   : > { %v911_v62 = vsel %vm591_vm4, %v901_v61, -inf }
 0x488   : > { %912 = vmax.xlane.f32.xlu0 %v911_v62 }
 0x495   : > { %946 = vrot.lane.b32.xlu1 %v4009_v29, %s4435_s22 }
 0x4a2   : > { %v904_v63 = vpop.xlane.xlu1 %903 }
 0x4a3   : > { %v914_v1 = vsub.f32 %v898_v46, %v904_v63  ;;  %v3224_v46 = vpack.c.bf16 %v1270_v45, %v1269_v44 }
 0x4a5   : > { %v918_v2 = vmul.f32 1.442695, %v914_v1 }
 0x4a7   : > { %3385 = vpow2.f32 %v918_v2 }
 0x4b1   : > { %v3386_v3 = vpop.eup %3385 }
 0x4b2   : > { %v926_v4 = vsel %vm591_vm4, %v3386_v3, 0.0 }
 0x4b9   : > { %927 = vadd.xlane.f32.xlu1 %v926_v4 }
 0x50d   : > { %v907_v5 = vpop.xlane.xlu0 %906 }
 0x50e   : > { %v915_v6 = vsub.f32 %v899_v51, %v907_v5 }
 0x510   : > { %v920_v7 = vmul.f32 1.442695, %v915_v6 }
 0x511   : > { %v910_v8 = vpop.xlane.xlu1 %909 }
 0x512   : > { %3387 = vpow2.f32 %v920_v7  ;;  %v916_v9 = vsub.f32 %v900_v56, %v910_v8  ;;  %v1388_v7 = vld [vmem:[%s4421_s8] sm:$0xff]  ;;  %v1390_v8 = vld [vmem:[%s4421_s8 + $0x10] sm:$0xff] }
 0x514   : > { %v922_v11 = vmul.f32 1.442695, %v916_v9 }
 0x515   : > { %v913_v12 = vpop.xlane.xlu0 %912  ;;  %v947_v14 = vpop.permute.xlu1 %946 }
 0x516   : > { %3389 = vpow2.f32 %v922_v11  ;;  %v917_v15 = vsub.f32 %v901_v61, %v913_v12  ;;  %3051 = vmatpush3.msra.mxu0 %v947_v14  ;;  %v1391_v11 = vld [vmem:[%s4421_s8 + $0x18] sm:$0xff] }
 0x517   : > { %3060 = vmatprep.subr.mxu0 %v3660_v13  ;;  %v3230_v12 = vpack.c.bf16 %v1391_v11, %v1390_v8 }
 0x518   : > { %v924_v16 = vmul.f32 1.442695, %v917_v15 }
 0x51a   : > { %3391 = vpow2.f32 %v924_v16 }
 0x51c   : > { %v3388_v17 = vpop.eup %3387 }
 0x51d   : > { %v929_v18 = vsel %vm591_vm4, %v3388_v17, 0.0 }
 0x51e   : > { %930 = vadd.xlane.f32.xlu0 %v929_v18 }
 0x520   : > { %v3390_v19 = vpop.eup %3389 }
 0x521   : > { %v932_v20 = vsel %vm591_vm4, %v3390_v19, 0.0 }
 0x522   : > { %933 = vadd.xlane.f32.xlu1 %v932_v20 }
 0x524   : > { %v3392_v21 = vpop.eup %3391 }
 0x525   : > { %v935_v22 = vsel %vm591_vm4, %v3392_v21, 0.0 }
 0x526   : > { %936 = vadd.xlane.f32.xlu0 %v935_v22 }
 0x533   : > { %1098 = vrot.lane.b32.xlu1 %v4023_v32, %s4435_s22 }
 0x537   : > { %1174 = vrot.lane.b32.xlu1 %v4027_v33, %s4435_s22 }
 0x53c   : > { %1022 = vrot.lane.b32.xlu0 %v4019_v31, %s4435_s22 }
 0x546   : > { %v928_v23 = vpop.xlane.xlu1 %927 }
 0x547   : > { %3393 = vrcp.f32 %v928_v23  ;;  %v2883_v23 = vld [vmem:[#allocation8] ss:$0 sm:$0xff] }
 0x551   : > { %v3394_v24 = vpop.eup %3393 }
 0x552   : > { %v942_v25 = vmul.f32 %v3394_v24, %v3386_v3 }
 0x554   : > { %3053 = vmatmul.mubr.msk.f32.vlgmr.msra.gmra.mrb[2].mxu0 %vm591_vm4, %v942_v25  ;;  %v2884_v25 = vld [vmem:[#allocation10] ss:$0 sm:$0xff] }
 0x555   : > { %3062 = vmatprep.mubr.msk.f32.mxu0 %vm3659_vm1, %v3660_v13 }
 0x5ab   : > { %v931_v26 = vpop.xlane.xlu0 %930 }
 0x5ac   : > { %3395 = vrcp.f32 %v931_v26 }
 0x5af   : > { %v934_v27 = vpop.xlane.xlu1 %933 }
 0x5b0   : > { %3397 = vrcp.f32 %v934_v27 }
 0x5b3   : > { %v937_v28 = vpop.xlane.xlu0 %936  ;;  %v1099_v29 = vpop.permute.xlu1 %1098 }
 0x5b4   : > { %3399 = vrcp.f32 %v937_v28  ;;  %3061 = vmatpush3.msra.mxu0 %v1099_v29 }
 0x5b5   : > { %3220 = vmatprep.subr.bf16.mxu0 %v3658_v10 }
 0x5b6   : > { %v3396_v30 = vpop.eup %3395 }
 0x5b7   : > { %v943_v31 = vmul.f32 %v3396_v30, %v3388_v17  ;;  %v1023_v32 = vpop.permute.xlu0 %1022  ;;  %v1175_v33 = vpop.permute.xlu1 %1174 }
 0x5b8   : > { %3056 = vmatpush3.msra.mxu1 %v1023_v32 }
 0x5b9   : > { %3058 = vmatmul.mubr.msk.f32.vlgmr.msra.gmra.mrb[8].mxu1 %vm591_vm4, %v943_v31  ;;  %3065 = vmatprep.subr.mxu1 %v3660_v13 }
 0x5ba   : > { %v3398_v34 = vpop.eup %3397  ;;  %3066 = vmatpush3.msra.mxu1 %v1175_v33  ;;  %3067 = vmatprep.mubr.msk.f32.mxu1 %vm3659_vm1, %v3660_v13 }
 0x5bb   : > { %v944_v35 = vmul.f32 %v3398_v34, %v3390_v19  ;;  %3226 = vmatprep.subr.bf16.mxu1 %v3658_v10 }
 0x5bd   : > { %3063 = vmatmul.mubr.msk.f32.vlgmr.msra.gmra.mrb[4].mxu0 %vm591_vm4, %v944_v35 }
 0x5be   : > { %v3400_v36 = vpop.eup %3399  ;;  %3078 = vmatprep.mubr.msk.f32.mxu0 %vm3659_vm1, %v3660_v13  ;;  %3222 = vmatpush3.bf16.msra.mxu0 %v3221_v42 }
 0x5bf   : > { %v945_v37 = vmul.f32 %v3400_v36, %v3392_v21  ;;  %3223 = vmatprep.subr.bf16.mxu0 %v3658_v10 }
 0x5c1   : > { %3068 = vmatmul.mubr.msk.f32.vlgmr.msra.gmra.mrb[10].mxu1 %vm591_vm4, %v945_v37 }
 0x5c2   : > { %3089 = vmatprep.mubr.msk.f32.mxu1 %vm3659_vm1, %v3660_v13  ;;  %3225 = vmatpush3.bf16.msra.mxu0 %v3224_v46 }
 0x5c3   : > { %3232 = vmatprep.subr.bf16.mxu0 %v3658_v10 }
 0x627   : > { %v1018_v38 = vpop.f32.mrb[2].mxu0 }
 0x628   : > { %v3054_v39 = vpop.f32.mrb[3].mxu0 }
 0x68c   : > { %v1094_v47 = vpop.f32.mrb[8].mxu1 }
 0x68d   : > { %1251 = vrot.lane.b32.xlu0 %v1094_v47, %s4434_s27  ;;  %v3059_v48 = vpop.f32.mrb[9].mxu1  ;;  %s4459_s27 = smov 16  }
 0x690   : > { %v1170_v49 = vpop.f32.mrb[4].mxu0 }
 0x691   : > { %1255 = vrot.lane.b32.xlu1 %v1170_v49, %s4433_s10  ;;  %v3064_v50 = vpop.f32.mrb[5].mxu0  ;;  %s4460_s10 = smov 24  }
 0x694   : > { %v1246_v51 = vpop.f32.mrb[10].mxu1 }
 0x695   : > { %1259 = vrot.lane.b32.xlu0 %v1246_v51, %s4432_s13  ;;  %v3069_v52 = vpop.f32.mrb[11].mxu1  ;;  %s4456_s13 = sld [smem:[#allocation17_spill]] }
 0x69b   : > { %v1474_v28 = vld [vmem:[%s4456_s13] sm:$0xff]  ;;  %v1475_v29 = vld [vmem:[%s4456_s13 + $0x8] sm:$0xff]  ;;  %v1476_v31 = vld [vmem:[%s4456_s13 + $0x10] sm:$0xff] }
 0x69c   : > { %v3233_v30 = vpack.c.bf16 %v1475_v29, %v1474_v28  ;;  %v1477_v32 = vld [vmem:[%s4456_s13 + $0x18] sm:$0xff]  ;;  %v1478_v34 = vld [vmem:[%s4456_s13 + $0x20] sm:$0xff]  ;;  %v1479_v35 = vld [vmem:[%s4456_s13 + $0x28] sm:$0xff] }
 0x69d   : > { %v3236_v33 = vpack.c.bf16 %v1477_v32, %v1476_v31  ;;  %v3239_v36 = vpack.c.bf16 %v1479_v35, %v1478_v34  ;;  %v1480_v37 = vld [vmem:[%s4456_s13 + $0x30] sm:$0xff] }
 0x6ff   : > { %v1252_v53 = vpop.permute.xlu0 %1251 }
 0x700   : > { %v1262_v55 = vsel %vm591_vm4, %v1018_v38, %v1252_v53  ;;  %v1481_v38 = vld [vmem:[%s4456_s13 + $0x38] sm:$0xff] }
 0x701   : > { %v3242_v39 = vpack.c.bf16 %v1481_v38, %v1480_v37 }
 0x703   : > { %v1256_v54 = vpop.permute.xlu1 %1255 }
 0x704   : > { %v1264_v56 = vsel %vm1263_vm6, %v1262_v55, %v1256_v54 }
 0x707   : > { %v1260_v57 = vpop.permute.xlu0 %1259 }
 0x708   : > { %v1266_v58 = vsel %vm1265_vm7, %v1264_v56, %v1260_v57 }
 0x709   : > { %3079 = vmatmul.mubr.msk.f32.vlgmr.msra.gmra.mrb[6].mxu0 %vm469_vm0, %v1266_v58 }
 0x70a   : > { %3108 = vmatprep.mubr.msk.f32.mxu0 %vm3659_vm1, %v3660_v13  ;;  %3234 = vmatpush3.bf16.msra.mxu0 %v3233_v30 }
 0x70b   : > { %3235 = vmatprep.subr.bf16.mxu0 %v3658_v10 }
 0x70e   : > { %3237 = vmatpush3.bf16.msra.mxu0 %v3236_v33 }
 0x70f   : > { %3238 = vmatprep.subr.bf16.mxu0 %v3658_v10 }
 0x712   : > { %3240 = vmatpush3.bf16.msra.mxu0 %v3239_v36 }
 0x713   : > { %3241 = vmatprep.subr.bf16.mxu0 %v3658_v10 }
 0x716   : > { %3243 = vmatpush3.bf16.msra.mxu0 %v3242_v39 }
 0x717   : > { %3132 = vmatprep.subr.mxu0 %v3660_v13 }
 0x7dc   : > { %v1347_v60 = vpop.f32.mrb[6].mxu0 }
 0x7dd   : > { %v1348_v61 = vadd.f32 %v2881_v59, %v1347_v60  ;;  %v3080_v62 = vpop.f32.mrb[7].mxu0 }
 0x7de   : > { %v2891_v62 = vld [vmem:[%s4416_s3 + $0x28] sm:$0xff] }
 0x7df   : > { %v4117_v63 = vadd.f32 %v1348_v61, %v3977_v0  ;;  %v1389_v0 = vld [vmem:[%s4421_s8 + $0x8] sm:$0xff]  ;;  %v2890_v61 = vld [vmem:[%s4416_s3 + $0x20] sm:$0xff] }
 0x7e0   : > { %v3227_v9 = vpack.c.bf16 %v1389_v0, %v1388_v7 }
 0x7e1   : > { %v1354_v1 = vsel %vm469_vm0, %v4117_v63, 0.0 }
 0x7e2   : > { %1355 = vadd.xlane.f32.xlu1 %v1354_v1  ;;  %3228 = vmatpush3.bf16.msra.mxu1 %v3227_v9  ;;  %v3245_v1 = vpack.c.bf16 %v2891_v62, %v2890_v61 }
 0x7e3   : > { %3229 = vmatprep.subr.bf16.mxu1 %v3658_v10 }
 0x7e6   : > { %3231 = vmatpush3.bf16.msra.mxu1 %v3230_v12 }
 0x7e7   : > { %3244 = vmatprep.subr.bf16.mxu1 %v3658_v10 }
 0x86f   : > { %v1356_v2 = vpop.xlane.xlu1 %1355 }
 0x870   : > { %v1357_v3 = vmul.f32 0.03125, %v1356_v2  ;;  %v2893_v2 = vld [vmem:[%s4416_s3 + $0x38] sm:$0xff] }
 0x872   : > { %v1358_v4 = vsub.f32 %v4117_v63, %v1357_v3 }
 0x874   : > { %v1359_v5 = vmul.f32 %v1358_v4, %v1358_v4 }
 0x876   : > { %v1360_v6 = vsel %vm469_vm0, %v1359_v5, 0.0 }
 0x877   : > { %1361 = vadd.xlane.f32.xlu0 %v1360_v6 }
 0x904   : > { %v1362_v14 = vpop.xlane.xlu0 %1361 }
 0x905   : > { %v1363_v15 = vmul.f32 0.03125, %v1362_v14  ;;  %v2888_v14 = vld [vmem:[%s4414_s1 + $0x1] ss:$0 sm:$0xff] }
 0x907   : > { %v1364_v16 = vadd.f32 1e-05, %v1363_v15 }
 0x909   : > { %3401 = vrsqrt.f32 %v1364_v16  ;;  %vm1367_vm8 = vcmp.eq.f32.partialorder %v1364_v16, inf  ;;  %v1370_v19 = vand.u32 2147483648, %v1364_v16  ;;  %vm1369_vm9 = vcmp.eq.f32.partialorder %v1364_v16, 0.0 }
 0x913   : > { %v3402_v17 = vpop.eup %3401 }
 0x914   : > { %v1366_v18 = vmul.f32 %v3402_v17, %v1364_v16 }
 0x916   : > { %v1368_v20 = vsel %vm1367_vm8, %v1364_v16, %v1366_v18  ;;  %v2889_v16 = vld [vmem:[#allocation5 + $0x1] ss:$0 sm:$0xff] }
 0x917   : > { %v1371_v21 = vsel %vm1369_vm9, %v1370_v19, %v1368_v20 }
 0x918   : > { %3403 = vrcp.f32 %v1371_v21 }
 0x922   : > { %v3404_v22 = vpop.eup %3403 }
 0x923   : > { %v1373_v24 = vmul.f32 %v3404_v22, %v1358_v4 }
 0x925   : > { %v1380_v26 = vmul.f32 %v2883_v23, %v1373_v24 }
 0x927   : > { %v1387_v27 = vadd.f32 %v2884_v25, %v1380_v26 }
 0x929   : > { %3090 = vmatmul.mubr.msk.f32.vlgmr.msra.gmra.mrb[12].mxu1 %vm469_vm0, %v1387_v27 }
 0x92a   : > { %3119 = vmatprep.mubr.msk.f32.mxu1 %vm3659_vm1, %v3660_v13  ;;  %3246 = vmatpush3.bf16.msra.mxu1 %v3245_v1 }
 0x92b   : > { %3247 = vmatprep.subr.bf16.mxu1 %v3658_v10 }
 0x9fc   : > { %v1461_v40 = vpop.f32.mrb[12].mxu1 }
 0x9fd   : > { %v1466_v41 = vmul.f32 0.044715, %v1461_v40  ;;  %v3091_v42 = vpop.f32.mrb[13].mxu1  ;;  %v1465_v49 = vmul.f32 0.5, %v1461_v40 }
 0x9ff   : > { %v1467_v44 = vmul.f32 %v1466_v41, %v1461_v40 }
 0xa01   : > { %v1468_v45 = vmul.f32 %v1467_v44, %v1461_v40 }
 0xa03   : > { %v1469_v46 = vadd.f32 %v1468_v45, %v1461_v40 }
 0xa05   : > { %v1470_v47 = vmul.f32 0.7978846, %v1469_v46 }
 0xa07   : > { %3405 = vtanh.f32 %v1470_v47 }
 0xa11   : > { %v3406_v48 = vpop.eup %3405 }
 0xa12   : > { %v1472_v50 = vadd.f32 1.0, %v3406_v48 }
 0xa14   : > { %v1473_v51 = vmul.f32 %v1472_v50, %v1465_v49 }
 0xa16   : > { %3109 = vmatmul.mubr.msk.f32.vlgmr.msra.gmra.mrb[8].mxu0 %vm1482_vm10, %v1473_v51 }
 0xa17   : > { %3134 = vmatprep.mubr.msk.f32.mxu0 %vm3659_vm1, %v3660_v13 }
 0xae9   : > { %v1552_v52 = vpop.f32.mrb[8].mxu0 }
 0xaea   : > { %v4172_v53 = vadd.f32 %v1552_v52, %v4117_v63  ;;  %v3110_v54 = vpop.f32.mrb[9].mxu0  ;;  %v2892_v63 = vld [vmem:[%s4416_s3 + $0x30] sm:$0xff] }
 0xaeb   : > { %v3248_v3 = vpack.c.bf16 %v2893_v2, %v2892_v63 }
 0xaec   : > { %v1561_v55 = vsel %vm469_vm0, %v4172_v53, 0.0 }
 0xaed   : > { %1562 = vadd.xlane.f32.xlu0 %v1561_v55  ;;  %3249 = vmatpush3.bf16.msra.mxu1 %v3248_v3 }
 0xaee   : > { %3122 = vmatprep.subr.mxu1 %v3660_v13 }
 0xb7a   : > { %v1563_v56 = vpop.xlane.xlu0 %1562 }
 0xb7b   : > { %v1564_v57 = vmul.f32 0.03125, %v1563_v56 }
 0xb7d   : > { %v1565_v58 = vsub.f32 %v4172_v53, %v1564_v57 }
 0xb7f   : > { %v1566_v59 = vmul.f32 %v1565_v58, %v1565_v58 }
 0xb81   : > { %v1567_v60 = vsel %vm469_vm0, %v1566_v59, 0.0 }
 0xb82   : > { %1568 = vadd.xlane.f32.xlu1 %v1567_v60 }
 0xc0f   : > { %v1569_v4 = vpop.xlane.xlu1 %1568 }
 0xc10   : > { %v1570_v5 = vmul.f32 0.03125, %v1569_v4 }
 0xc12   : > { %v1571_v6 = vadd.f32 1e-05, %v1570_v5 }
 0xc14   : > { %3407 = vrsqrt.f32 %v1571_v6  ;;  %vm1574_vm11 = vcmp.eq.f32.partialorder %v1571_v6, inf  ;;  %v1577_v8 = vand.u32 2147483648, %v1571_v6  ;;  %vm1576_vm12 = vcmp.eq.f32.partialorder %v1571_v6, 0.0 }
 0xc1e   : > { %v3408_v7 = vpop.eup %3407 }
 0xc1f   : > { %v1573_v0 = vmul.f32 %v3408_v7, %v1571_v6 }
 0xc21   : > { %v1575_v9 = vsel %vm1574_vm11, %v1571_v6, %v1573_v0 }
 0xc22   : > { %v1578_v11 = vsel %vm1576_vm12, %v1577_v8, %v1575_v9 }
 0xc23   : > { %3409 = vrcp.f32 %v1578_v11 }
 0xc2d   : > { %v3410_v12 = vpop.eup %3409 }
 0xc2e   : > { %v1580_v15 = vmul.f32 %v3410_v12, %v1565_v58 }
 0xc30   : > { %v1587_v17 = vmul.f32 %v2888_v14, %v1580_v15 }
 0xc32   : > { %v1594_v18 = vadd.f32 %v2889_v16, %v1587_v17 }
 0xc34   : > { %3120 = vmatmul.mubr.msk.f32.vlgmr.msra.gmra.mrb[14].mxu1 %vm469_vm0, %v1594_v18 }
 0xc35   : > { %3124 = vmatprep.mubr.msk.f32.mxu1 %vm3659_vm1, %v3660_v13 }
 0xd07   : > { %v1669_v19 = vpop.f32.mrb[14].mxu1 }
 0xd08   : > { %1676 = vrot.lane.b32.xlu1 %v1669_v19, %s3663_s24  ;;  %1674 = vrot.lane.b32.xlu0 %v1669_v19, %s3662_s29  ;;  %v3121_v20 = vpop.f32.mrb[15].mxu1  ;;  %s4461_s24 = sld [smem:[#allocation18_spill]] }
 0xd0c   : > { %1678 = vrot.lane.b32.xlu1 %v1669_v19, %s3661_s15  ;;  %1680 = vrot.lane.b32.xlu0 %v1669_v19, %s3664_s30  ;;  %s4457_s15 = smov 64  }
 0xd7a   : > { %v4202_v21 = vpop.permute.xlu1 %1676  ;;  %v4204_v22 = vpop.permute.xlu0 %1674 }
 0xd7b   : > { %1832 = vrot.lane.b32.xlu0 %v4202_v21, %s3664_s30  ;;  %1756 = vrot.lane.b32.xlu1 %v4204_v22, %s3664_s30 }
 0xd7e   : > { %v4210_v23 = vpop.permute.xlu1 %1678  ;;  %v1681_v24 = vpop.permute.xlu0 %1680 }
 0xd7f   : > { %1908 = vrot.lane.b32.xlu1 %v4210_v23, %s3664_s30  ;;  %3123 = vmatpush3.xpose.msk.msra.mxu1 %vm591_vm4, %v1681_v24  ;;  %v2908_v24 = vld [vmem:[%s4417_s4 + $0x28] sm:$0xff] }
 0xd80   : > { %3127 = vmatprep.subr.mxu1 %v3660_v13 }
 0xd82   : > { %3125 = vmatmul.mubr.msk.f32.vlgmr.msra.gmra.mrb[16].mxu1 %vm591_vm4, %v1669_v19 }
 0xd83   : > { %3129 = vmatprep.mubr.msk.f32.mxu1 %vm3659_vm1, %v3660_v13 }
 0xded   : > { %v1757_v25 = vpop.permute.xlu1 %1756  ;;  %v1833_v26 = vpop.permute.xlu0 %1832 }
 0xdee   : > { %3128 = vmatpush3.xpose.msk.msra.mxu1 %vm591_vm4, %v1757_v25  ;;  %3133 = vmatpush3.xpose.msk.msra.mxu0 %vm591_vm4, %v1833_v26 }
 0xdef   : > { %3137 = vmatprep.subr.mxu1 %v3660_v13  ;;  %3142 = vmatprep.subr.mxu0 %v3660_v13 }
 0xdf1   : > { %v1909_v27 = vpop.permute.xlu1 %1908  ;;  %3130 = vmatmul.mubr.msk.f32.vlgmr.msra.gmra.mrb[18].mxu1 %vm591_vm4, %v4204_v22  ;;  %3135 = vmatmul.mubr.msk.f32.vlgmr.msra.gmra.mrb[10].mxu0 %vm591_vm4, %v4202_v21 }
 0xdf2   : > { %3138 = vmatpush3.xpose.msk.msra.mxu1 %vm591_vm4, %v1909_v27  ;;  %3139 = vmatprep.mubr.msk.f32.mxu1 %vm3659_vm1, %v3660_v13 }
 0xdf3   : > { %3144 = vmatprep.mubr.msk.f32.mxu0 %vm3659_vm1, %v3660_v13  ;;  %3147 = vmatprep.subr.mxu1 %v3660_v13 }
 0xdf5   : > { %3140 = vmatmul.mubr.msk.f32.vlgmr.msra.gmra.mrb[20].mxu1 %vm591_vm4, %v4210_v23 }
 0xdf6   : > { %3149 = vmatprep.mubr.msk.f32.mxu1 %vm3659_vm1, %v3660_v13 }
 0xe55   : > { %v1752_v28 = vpop.f32.mrb[16].mxu1 }
 0xe56   : > { %v1984_v29 = vmul.f32 0.35355338, %v1752_v28  ;;  %v3126_v30 = vpop.f32.mrb[17].mxu1  ;;  %v2909_v28 = vld [vmem:[%s4417_s4 + $0x30] sm:$0xff] }
 0xe58   : > { %v1988_v31 = vadd.f32 %v1984_v29, %v4055_v43  ;;  %v2910_v29 = vld [vmem:[%s4417_s4 + $0x38] sm:$0xff] }
 0xe59   : > { %v3254_v30 = vpack.c.bf16 %v2910_v29, %v2909_v28 }
 0xe5a   : > { %v1992_v32 = vsel %vm591_vm4, %v1988_v31, -inf }
 0xe5b   : > { %1993 = vmax.xlane.f32.xlu0 %v1992_v32 }
 0xec4   : > { %v1828_v33 = vpop.f32.mrb[18].mxu1  ;;  %v1904_v34 = vpop.f32.mrb[10].mxu0 }
 0xec5   : > { %v1985_v35 = vmul.f32 0.35355338, %v1828_v33  ;;  %v1986_v36 = vmul.f32 0.35355338, %v1904_v34  ;;  %v3131_v37 = vpop.f32.mrb[19].mxu1  ;;  %v3136_v38 = vpop.f32.mrb[11].mxu0 }
 0xec7   : > { %v1989_v39 = vadd.f32 %v1985_v35, %v4055_v43  ;;  %v1990_v40 = vadd.f32 %v1986_v36, %v4055_v43 }
 0xec8   : > { %v1980_v41 = vpop.f32.mrb[20].mxu1 }
 0xec9   : > { %v1987_v42 = vmul.f32 0.35355338, %v1980_v41  ;;  %v3141_v44 = vpop.f32.mrb[21].mxu1  ;;  %v1995_v45 = vsel %vm591_vm4, %v1989_v39, -inf  ;;  %v1998_v46 = vsel %vm591_vm4, %v1990_v40, -inf }
 0xeca   : > { %1996 = vmax.xlane.f32.xlu1 %v1995_v45  ;;  %1999 = vmax.xlane.f32.xlu0 %v1998_v46  ;;  %v2911_v44 = vld [vmem:[#allocation7 + $0x1] ss:$0 sm:$0xff] }
 0xecb   : > { %v1991_v47 = vadd.f32 %v1987_v42, %v4055_v43 }
 0xecd   : > { %v2001_v48 = vsel %vm591_vm4, %v1991_v47, -inf }
 0xece   : > { %2002 = vmax.xlane.f32.xlu0 %v2001_v48 }
 0xedb   : > { %2036 = vrot.lane.b32.xlu1 %v1669_v19, %s4457_s15 }
 0xee8   : > { %v1994_v49 = vpop.xlane.xlu0 %1993 }
 0xee9   : > { %v2004_v50 = vsub.f32 %v1988_v31, %v1994_v49 }
 0xeeb   : > { %v2008_v51 = vmul.f32 1.442695, %v2004_v50 }
 0xeed   : > { %3411 = vpow2.f32 %v2008_v51 }
 0xef7   : > { %v3412_v52 = vpop.eup %3411 }
 0xef8   : > { %v2016_v54 = vsel %vm591_vm4, %v3412_v52, 0.0 }
 0xeff   : > { %2017 = vadd.xlane.f32.xlu1 %v2016_v54 }
 0xf57   : > { %v1997_v55 = vpop.xlane.xlu1 %1996  ;;  %v2000_v56 = vpop.xlane.xlu0 %1999 }
 0xf58   : > { %v2005_v57 = vsub.f32 %v1989_v39, %v1997_v55  ;;  %v2006_v58 = vsub.f32 %v1990_v40, %v2000_v56  ;;  %v2915_v56 = vld [vmem:[%s4421_s8 + $0x20] sm:$0xff] }
 0xf5a   : > { %v2010_v59 = vmul.f32 1.442695, %v2005_v57  ;;  %v2012_v60 = vmul.f32 1.442695, %v2006_v58  ;;  %v2917_v57 = vld [vmem:[%s4421_s8 + $0x30] sm:$0xff] }
 0xf5b   : > { %v2037_v43 = vpop.permute.xlu1 %2036  ;;  %v2003_v61 = vpop.xlane.xlu0 %2002 }
 0xf5c   : > { %3413 = vpow2.f32 %v2010_v59  ;;  %v2007_v62 = vsub.f32 %v1991_v47, %v2003_v61  ;;  %3143 = vmatpush3.msra.mxu0 %v2037_v43  ;;  %v2918_v59 = vld [vmem:[%s4421_s8 + $0x38] sm:$0xff] }
 0xf5d   : > { %3415 = vpow2.f32 %v2012_v60  ;;  %3152 = vmatprep.subr.mxu0 %v3660_v13  ;;  %v3260_v60 = vpack.c.bf16 %v2918_v59, %v2917_v57 }
 0xf5e   : > { %v2014_v63 = vmul.f32 1.442695, %v2007_v62 }
 0xf60   : > { %3417 = vpow2.f32 %v2014_v63 }
 0xf66   : > { %v3414_v1 = vpop.eup %3413 }
 0xf67   : > { %v3416_v2 = vpop.eup %3415  ;;  %v2019_v3 = vsel %vm591_vm4, %v3414_v1, 0.0 }
 0xf68   : > { %2020 = vadd.xlane.f32.xlu0 %v2019_v3  ;;  %v2022_v4 = vsel %vm591_vm4, %v3416_v2, 0.0 }
 0xf69   : > { %2023 = vadd.xlane.f32.xlu1 %v2022_v4 }
 0xf6a   : > { %v3418_v5 = vpop.eup %3417 }
 0xf6b   : > { %v2025_v6 = vsel %vm591_vm4, %v3418_v5, 0.0 }
 0xf6c   : > { %2026 = vadd.xlane.f32.xlu0 %v2025_v6  ;;  %v2913_v6 = vld [vmem:[#allocation8 + $0x1] ss:$0 sm:$0xff] }
 0xf7a   : > { %2188 = vrot.lane.b32.xlu1 %v4202_v21, %s4457_s15 }
 0xf7e   : > { %2264 = vrot.lane.b32.xlu1 %v4210_v23, %s4457_s15  ;;  %v2907_v23 = vld [vmem:[%s4417_s4 + $0x20] sm:$0xff] }
 0xf7f   : > { %v3251_v25 = vpack.c.bf16 %v2908_v24, %v2907_v23  ;;  %v2650_v23 = vld [vmem:[%s4461_s24] sm:$0xff]  ;;  %v2651_v24 = vld [vmem:[%s4461_s24 + $0x8] sm:$0xff] }
 0xf82   : > { %2112 = vrot.lane.b32.xlu0 %v4204_v22, %s4457_s15 }
 0xf8c   : > { %v2018_v7 = vpop.xlane.xlu1 %2017 }
 0xf8d   : > { %3419 = vrcp.f32 %v2018_v7 }
 0xf97   : > { %v3420_v0 = vpop.eup %3419 }
 0xf98   : > { %v2032_v8 = vmul.f32 %v3420_v0, %v3412_v52  ;;  %v2914_v0 = vld [vmem:[#allocation10 + $0x1] ss:$0 sm:$0xff] }
 0xf9a   : > { %3145 = vmatmul.mubr.msk.f32.vlgmr.msra.gmra.mrb[12].mxu0 %vm591_vm4, %v2032_v8 }
 0xf9b   : > { %3154 = vmatprep.mubr.msk.f32.mxu0 %vm3659_vm1, %v3660_v13 }
 0xff5   : > { %v2021_v9 = vpop.xlane.xlu0 %2020 }
 0xff6   : > { %v2024_v11 = vpop.xlane.xlu1 %2023  ;;  %3421 = vrcp.f32 %v2021_v9 }
 0xff7   : > { %3423 = vrcp.f32 %v2024_v11  ;;  %v2920_v11 = vld [vmem:[%s4456_s13 + $0x40] sm:$0xff] }
 0xff9   : > { %v2027_v12 = vpop.xlane.xlu0 %2026 }
 0xffa   : > { %v2189_v14 = vpop.permute.xlu1 %2188  ;;  %3425 = vrcp.f32 %v2027_v12  ;;  %v2921_v12 = vld [vmem:[%s4456_s13 + $0x48] sm:$0xff] }
 0xffb   : > { %3153 = vmatpush3.msra.mxu0 %v2189_v14  ;;  %v3263_v14 = vpack.c.bf16 %v2921_v12, %v2920_v11 }
 0xffc   : > { %3250 = vmatprep.subr.bf16.mxu0 %v3658_v10 }
 0xffd   : > { %v2113_v15 = vpop.permute.xlu0 %2112 }
 0xffe   : > { %3148 = vmatpush3.msra.mxu1 %v2113_v15  ;;  %v2265_v20 = vpop.permute.xlu1 %2264  ;;  %v2922_v15 = vld [vmem:[%s4456_s13 + $0x50] sm:$0xff] }
 0xfff   : > { %3157 = vmatprep.subr.mxu1 %v3660_v13 }
0x1000   : > { %v3422_v16 = vpop.eup %3421 }
0x1001   : > { %v3424_v17 = vpop.eup %3423  ;;  %v2033_v18 = vmul.f32 %v3422_v16, %v3414_v1 }
0x1002   : > { %v2034_v19 = vmul.f32 %v3424_v17, %v3416_v2  ;;  %v2924_v17 = vld [vmem:[%s4456_s13 + $0x60] sm:$0xff] }
0x1003   : > { %3150 = vmatmul.mubr.msk.f32.vlgmr.msra.gmra.mrb[22].mxu1 %vm591_vm4, %v2033_v18  ;;  %v2925_v18 = vld [vmem:[%s4456_s13 + $0x68] sm:$0xff] }
0x1004   : > { %v3426_v21 = vpop.eup %3425  ;;  %3155 = vmatmul.mubr.msk.f32.vlgmr.msra.gmra.mrb[14].mxu0 %vm591_vm4, %v2034_v19  ;;  %3158 = vmatpush3.msra.mxu1 %v2265_v20  ;;  %v3269_v19 = vpack.c.bf16 %v2925_v18, %v2924_v17  ;;  %v2926_v20 = vld [vmem:[%s4456_s13 + $0x70] sm:$0xff] }
0x1005   : > { %v2035_v22 = vmul.f32 %v3426_v21, %v3418_v5  ;;  %3159 = vmatprep.mubr.msk.f32.mxu1 %vm3659_vm1, %v3660_v13  ;;  %3170 = vmatprep.mubr.msk.f32.mxu0 %vm3659_vm1, %v3660_v13  ;;  %v2927_v21 = vld [vmem:[%s4456_s13 + $0x78] sm:$0xff] }
0x1006   : > { %3256 = vmatprep.subr.bf16.mxu1 %v3658_v10  ;;  %3252 = vmatpush3.bf16.msra.mxu0 %v3251_v25  ;;  %v3275_v25 = vpack.c.bf16 %v2651_v24, %v2650_v23 }
0x1007   : > { %3160 = vmatmul.mubr.msk.f32.vlgmr.msra.gmra.mrb[24].mxu1 %vm591_vm4, %v2035_v22  ;;  %3253 = vmatprep.subr.bf16.mxu0 %v3658_v10  ;;  %v3272_v22 = vpack.c.bf16 %v2927_v21, %v2926_v20 }
0x1008   : > { %3181 = vmatprep.mubr.msk.f32.mxu1 %vm3659_vm1, %v3660_v13 }
0x100a   : > { %3255 = vmatpush3.bf16.msra.mxu0 %v3254_v30 }
0x100b   : > { %3262 = vmatprep.subr.bf16.mxu0 %v3658_v10 }
0x106d   : > { %v2108_v26 = vpop.f32.mrb[12].mxu0 }
0x106e   : > { %v3146_v27 = vpop.f32.mrb[13].mxu0 }
0x10d6   : > { %v2184_v31 = vpop.f32.mrb[22].mxu1 }
0x10d7   : > { %v2260_v32 = vpop.f32.mrb[14].mxu0  ;;  %2341 = vrot.lane.b32.xlu0 %v2184_v31, %s4458_s28  ;;  %v3151_v33 = vpop.f32.mrb[23].mxu1  ;;  %s2931_s28 = sshll.u32 %s3752_s23, 7  ;;  %s3670_s23 = smov [#allocation11]  }
0x10d8   : > { %2345 = vrot.lane.b32.xlu1 %v2260_v32, %s4459_s27  ;;  %v3156_v34 = vpop.f32.mrb[15].mxu0  ;;  %s4462_s27 = sshll.u32 %s3959_s2, 3  ;;  %s4368_s12 = scalar_lea.hbm %s4463_s26, %s2931_s28 }
0x10d9   : > { %s3579_s22 = sshll.u32 %s3670_s23, 4  ;;  %s3580_s22 = int_to_ptr.vmem [resolvable:$false] %s3579_s22 }
0x10da   : > { %v2336_v35 = vpop.f32.mrb[24].mxu1  ;;  %s3581_s28 = scalar_lea.vmem %s3580_s22, 256 }
0x10db   : > { %2349 = vrot.lane.b32.xlu0 %v2336_v35, %s4460_s10  ;;  %v3161_v36 = vpop.f32.mrb[25].mxu1  ;;  %s459_s10 = scalar_lea.vmem [#allocation11], %s4462_s27 }
0x10dc   : > { %s2742_s15 = sshll.u32 %s459_s10, 4  ;;  %s4370_s15 = int_to_ptr.vmem [resolvable:$true] %s2742_s15 }
0x10dd   : > { %s3575_s25 = scalar_lea.vmem %s4370_s15, 128  ;;  %p3582_p12 = scmp.lt.s32.totalorder %s4370_s15, %s3580_s22 }
0x10de   : > { %p3576_p6 = scmp.ne.s32.totalorder %s4370_s15, %s3575_s25  ;;  %p3583_p3 = scmp.lt.s32.totalorder %s3581_s28, %s3575_s25 }
0x10e0   : > { %p3577_p7 = pnand %p3576_p6, %p4464_p5  ;;  %p3584_p13 = por %p3583_p3, %p3582_p12 }
0x10e2   : > { %p3578_p9 = pneg %p3577_p7 }
0x10e4   : > { %p3585_p0 = pnand %p3584_p13, %p3578_p9 }
0x1149   : > { %v2342_v37 = vpop.permute.xlu0 %2341 }
0x114a   : > { %v2352_v38 = vsel %vm591_vm4, %v2108_v26, %v2342_v37  ;;  %v2346_v39 = vpop.permute.xlu1 %2345  ;;  %v2653_v37 = vld [vmem:[%s4461_s24 + $0x18] sm:$0xff] }
0x114b   : > { %v2353_v40 = vsel %vm1263_vm6, %v2352_v38, %v2346_v39 }
0x114d   : > { %v2350_v41 = vpop.permute.xlu0 %2349 }
0x114e   : > { %v2354_v42 = vsel %vm1265_vm7, %v2353_v40, %v2350_v41 }
0x114f   : > { %3171 = vmatmul.mubr.msk.f32.vlgmr.msra.gmra.mrb[16].mxu0 %vm469_vm0, %v2354_v42 }
0x1150   : > { %3200 = vmatprep.mubr.msk.f32.mxu0 %vm3659_vm1, %v3660_v13  ;;  %3264 = vmatpush3.bf16.msra.mxu0 %v3263_v14 }
0x1151   : > { %3265 = vmatprep.subr.bf16.mxu0 %v3658_v10 }
0x1222   : > { %v2437_v45 = vpop.f32.mrb[16].mxu0 }
0x1223   : > { %v2438_v46 = vadd.f32 %v2911_v44, %v2437_v45  ;;  %v3172_v47 = vpop.f32.mrb[17].mxu0 }
0x1225   : > { %v4296_v48 = vadd.f32 %v2438_v46, %v4172_v53  ;;  %v2916_v53 = vld [vmem:[%s4421_s8 + $0x28] sm:$0xff] }
0x1226   : > { %v3257_v58 = vpack.c.bf16 %v2916_v53, %v2915_v56 }
0x1227   : > { %v2446_v49 = vsel %vm469_vm0, %v4296_v48, 0.0 }
0x1228   : > { %2447 = vadd.xlane.f32.xlu1 %v2446_v49  ;;  %3258 = vmatpush3.bf16.msra.mxu1 %v3257_v58 }
0x1229   : > { %3259 = vmatprep.subr.bf16.mxu1 %v3658_v10 }
0x122c   : > { %3261 = vmatpush3.bf16.msra.mxu1 %v3260_v60 }
0x122d   : > { %3274 = vmatprep.subr.bf16.mxu1 %v3658_v10 }
0x12b5   : > { %v2448_v50 = vpop.xlane.xlu1 %2447 }
0x12b6   : > { %v2449_v51 = vmul.f32 0.03125, %v2448_v50 }
0x12b8   : > { %v2450_v52 = vsub.f32 %v4296_v48, %v2449_v51 }
0x12ba   : > { %v2451_v54 = vmul.f32 %v2450_v52, %v2450_v52 }
0x12bc   : > { %v2452_v55 = vsel %vm469_vm0, %v2451_v54, 0.0 }
0x12bd   : > { %2453 = vadd.xlane.f32.xlu0 %v2452_v55 }
0x134a   : > { %v2454_v43 = vpop.xlane.xlu0 %2453 }
0x134b   : > { %v2455_v61 = vmul.f32 0.03125, %v2454_v43 }
0x134d   : > { %v2456_v62 = vadd.f32 1e-05, %v2455_v61 }
0x134f   : > { %3427 = vrsqrt.f32 %v2456_v62  ;;  %vm2459_vm13 = vcmp.eq.f32.partialorder %v2456_v62, inf  ;;  %v2462_v2 = vand.u32 2147483648, %v2456_v62  ;;  %vm2461_vm14 = vcmp.eq.f32.partialorder %v2456_v62, 0.0 }
0x1359   : > { %v3428_v63 = vpop.eup %3427 }
0x135a   : > { %v2458_v1 = vmul.f32 %v3428_v63, %v2456_v62 }
0x135c   : > { %v2460_v3 = vsel %vm2459_vm13, %v2456_v62, %v2458_v1 }
0x135d   : > { %v2463_v4 = vsel %vm2461_vm14, %v2462_v2, %v2460_v3 }
0x135e   : > { %3429 = vrcp.f32 %v2463_v4 }
0x1368   : > { %v3430_v5 = vpop.eup %3429 }
0x1369   : > { %v2465_v7 = vmul.f32 %v3430_v5, %v2450_v52 }
0x136b   : > { %v2472_v8 = vmul.f32 %v2913_v6, %v2465_v7 }
0x136d   : > { %v2479_v9 = vadd.f32 %v2914_v0, %v2472_v8 }
0x136f   : > { %3182 = vmatmul.mubr.msk.f32.vlgmr.msra.gmra.mrb[26].mxu1 %vm469_vm0, %v2479_v9 }
0x1370   : > { %3211 = vmatprep.mubr.msk.f32.mxu1 %vm3659_vm1, %v3660_v13  ;;  %v2923_v13 = vld [vmem:[%s4456_s13 + $0x58] sm:$0xff]  ;;  %3276 = vmatpush3.bf16.msra.mxu1 %v3275_v25 }
0x1371   : > { %v3266_v16 = vpack.c.bf16 %v2923_v13, %v2922_v15  ;;  %3277 = vmatprep.subr.bf16.mxu1 %v3658_v10 }
0x1373   : > { %3267 = vmatpush3.bf16.msra.mxu0 %v3266_v16 }
0x1374   : > { %3268 = vmatprep.subr.bf16.mxu0 %v3658_v10 }
0x1377   : > { %3270 = vmatpush3.bf16.msra.mxu0 %v3269_v19 }
0x1378   : > { %3271 = vmatprep.subr.bf16.mxu0 %v3658_v10  ;;  %v2652_v10 = vld [vmem:[%s4461_s24 + $0x10] sm:$0xff] }
0x1379   : > { %v3278_v38 = vpack.c.bf16 %v2653_v37, %v2652_v10 }
0x137b   : > { %3273 = vmatpush3.bf16.msra.mxu0 %v3272_v22  ;;  %3279 = vmatpush3.bf16.msra.mxu1 %v3278_v38 }
0x1442   : > { %v2554_v26 = vpop.f32.mrb[26].mxu1 }
0x1443   : > { %v2559_v27 = vmul.f32 0.044715, %v2554_v26  ;;  %v3183_v28 = vpop.f32.mrb[27].mxu1  ;;  %v2558_v34 = vmul.f32 0.5, %v2554_v26 }
0x1445   : > { %v2560_v29 = vmul.f32 %v2559_v27, %v2554_v26 }
0x1447   : > { %v2561_v30 = vmul.f32 %v2560_v29, %v2554_v26 }
0x1449   : > { %v2562_v31 = vadd.f32 %v2561_v30, %v2554_v26 }
0x144b   : > { %v2563_v32 = vmul.f32 0.7978846, %v2562_v31 }
0x144d   : > { %3431 = vtanh.f32 %v2563_v32 }
0x1457   : > { %v3432_v33 = vpop.eup %3431 }
0x1458   : > { %v2565_v35 = vadd.f32 1.0, %v3432_v33 }
0x145a   : > { %v2566_v36 = vmul.f32 %v2565_v35, %v2558_v34 }
0x145c   : > { %3201 = vmatmul.mubr.msk.f32.vlgmr.msra.gmra.mrb[18].mxu0 %vm1482_vm10, %v2566_v36 }
0x152f   : > { %v2645_v39 = vpop.f32.mrb[18].mxu0 }
0x1530   : > { %v2649_v40 = vadd.f32 %v2645_v39, %v4296_v48  ;;  %v3202_v41 = vpop.f32.mrb[19].mxu0 }
0x1532   : > { %3212 = vmatmul.mubr.msk.f32.vlgmr.msra.gmra.mrb[28].mxu1 %vm469_vm0, %v2649_v40 }
0x1605   : > { %v2723_v42 = vpop.f32.mrb[28].mxu1 }
0x1606   : > { %2727 = vst.msk [vmem:[%s459_s10] sm:$0xff] %vm1482_vm10, %v2723_v42  ;;  %v3213_v44 = vpop.f32.mrb[29].mxu1 }
0x1607   : > { %3588 = shalt.err (!%p3585_p0)
}
0x1608   : > { %s3589_s2 = scalar_lea.hbm %s4368_s12, 128  ;;  %s3593_s29 = scalar_lea.hbm %s4463_s26, 256 }
0x1609   : > { %p3590_p2 = scmp.ne.s32.totalorder %s4368_s12, %s3589_s2  ;;  %p3594_p10 = scmp.lt.u32.totalorder %s4368_s12, %s4463_s26 }
0x160a   : > { %p3595_p11 = scmp.lt.u32.totalorder %s3593_s29, %s3589_s2  ;;  %p3597_p6 = scmp.lt.u32.totalorder %s3589_s2, %s4368_s12 }
0x160b   : > { %p3591_p8 = pnand %p3590_p2, %p4464_p5 }
0x160c   : > { %p3596_p1 = por %p3595_p11, %p3594_p10 }
0x160d   : > { %p3592_p4 = pneg %p3591_p8 }
0x160e   : > { %p3598_p7 = por %p3597_p6, %p3596_p1 }
0x1610   : > { %p3599_p9 = pnand %p3598_p7, %p3592_p4 }
0x1612   : > { %3602 = shalt.err (!%p3599_p9)
}
0x1613   : > { %3298 = dma.vmem_to_hbm [thread:$0]  (%p4464_p5), %s4370_s15, 128, %s4368_s12, %s2729_s9  }
0x1614 PF: > { %s2754_s25 = sand.u32 1, %s3637_s17   ;;  %p4465_p12 = scmp.ne.s32.totalorder %s4449_s21, 0 }
0x1615   : > { %p4466_p3 = scmp.ge.s32.totalorder %s3649_s20, 2  ;;  %s2755_s22 = scalar_lea.sflag [#allocation4], %s2754_s25 }
0x1617   : > { %p3318_p13 = pnand %p4466_p3, %p4465_p12 }
0x1619   : > { %3632 = dma.done.wait (!%p3318_p13), %s2755_s22, 128  }
0x161a   : > { %3634 = vsyncadd (!%p3318_p13), %s2755_s22, 4294967168  ;;  %p26_p0 = scmp.ge.s32.totalorder %s3883_s16, 4   ;;  %s4467_s17 = smov %s3641_s18 }
0x161b   : > { %s4468_s18 = smov %s3645_s19  ;;  %s4469_s19 = smov %s3894_s14 }
0x161c   : > { %s4470_s20 = smov %s3883_s16  ;;  %28 = sbr.rel (!%p26_p0) target bundleno = 12 (0xc), region = 134 }
0x1623   :  { %2760 = vsyncpa [#allocation3], 1 }
0x1624   :  { %2762 = vsyncpa [#allocation3 + $0x1], 1 }
0x1625   :  { %2763 = vsyncpa [#allocation6], 1 }
0x1626   :  { %2764 = vsyncpa [#allocation9], 1 }
0x1627   :  { %2765 = vsyncpa [#allocation4], 1 }
0x1628   :  { %2767 = vsyncpa [#allocation4 + $0x1], 1 }

</bundles_post_ra>
